<compile_context>
chip_gen: v7x
topology: tpu7x:2x2x1
jax: 0.10.0
libtpu: 0.0.40
codegen_flags: <defaults>
</compile_context>

<pallas_src>
import functools

import jax
import jax.numpy as jnp
from jax import lax
from jax.experimental import pallas as pl
from jax.experimental.pallas import tpu as pltpu


def _round_up(x, m):
    return (x + m - 1) // m * m


def _next_pow2(n):
    p = 1
    while p < n:
        p *= 2
    return p


# ----------------------------------------------------------------------------
# Kernel: whole network for one (folded) batch tile.
#   w1_ref/w2_ref: (n_blocks, F, F) bf16   block-diagonal (G copies of SxS weight)
#   b1_ref/b2_ref: (n_blocks, 1, F) f32    (real bias tiled xG along lanes)
#   wf_ref:        (F, No) bf16            block-diagonal head, No = G*d_out
#   bf_ref:        (1, No) f32
#   x_ref:         (TBf, F) f32            folded activations (padded lanes == 0)
#   o_ref:         (TBf, No) f32           folded (packed) outputs
#
# Correctness invariant: padded weight columns and padded bias lanes are exactly
# zero, and sin(0) == 0, so the padded lanes of every sample slot stay zero
# through every block; therefore `h + x` reproduces the PyTorch zero-pad-then-add
# residual, and the block-diagonal structure keeps the G folded samples independent.
# ----------------------------------------------------------------------------
def _mlp_kernel(w1_ref, b1_ref, w2_ref, b2_ref, wf_ref, bf_ref, x_ref, o_ref, *,
                act_dtype):
    n_blocks = w1_ref.shape[0]
    x0 = x_ref[...].astype(act_dtype)  # (TBf, F)

    def block(i, x):
        h = jnp.dot(x.astype(jnp.bfloat16), w1_ref[i],
                    preferred_element_type=jnp.float32) + b1_ref[i]
        h = jnp.sin(h.astype(act_dtype))
        h = jnp.dot(h.astype(jnp.bfloat16), w2_ref[i],
                    preferred_element_type=jnp.float32) + b2_ref[i]
        h = jnp.sin(h.astype(act_dtype))
        return (h + x).astype(act_dtype)  # zero-pad residual (padded lanes stay 0)

    # Full unroll for small depths (LLO scheduling visibility); cap at 8 so deep
    # nets don't blow up code size / vreg live ranges.
    x = lax.fori_loop(0, n_blocks, block, x0, unroll=min(n_blocks, 8))

    out = jnp.dot(x.astype(jnp.bfloat16), wf_ref[...],
                  preferred_element_type=jnp.float32) + bf_ref[...]
    o_ref[...] = out.astype(o_ref.dtype)


# ----------------------------------------------------------------------------
# Wrapper: fold / pad params once, tile only over (folded) batch rows.
# ----------------------------------------------------------------------------
def net_forward_pallas(params, x, layers, *, batch_tile=4096, act_dtype=jnp.float32):
    n_blocks = len(layers) - 2
    d_in, d_out = layers[0], layers[-1]
    # PyTorch module requires layers[i+1] >= layers[i] for the zero-pad residual.
    for i in range(n_blocks):
        assert layers[i + 1] >= layers[i], "hidden widths must be nondecreasing"

    # ---- fold geometry ----------------------------------------------------
    S_raw = max(layers[:-1])            # widest per-sample activation width
    S = _next_pow2(S_raw)               # per-sample lane slot (divides 128 if <=128)
    if S <= 128:
        G = 128 // S                    # samples folded into one 128-lane row
        F = 128
    else:                               # wide nets: no fold, plain lane padding
        G = 1
        S = _round_up(S_raw, 128)
        F = S
    No = G * d_out                      # packed output lanes per folded row

    # ---- fold / pad parameters (zero padding is REQUIRED; see kernel docstring)
    eye_g = jnp.eye(G, dtype=jnp.float32)

    def fold_w(w):                      # (r, c) real weight -> (F, F) block-diagonal
        wp = jnp.zeros((S, S), jnp.float32).at[:w.shape[0], :w.shape[1]].set(w)
        return jnp.kron(eye_g, wp)

    def fold_b(b):                      # (c,) real bias -> (1, F) tiled xG
        bp = jnp.zeros((S,), jnp.float32).at[:b.shape[0]].set(b)
        return jnp.tile(bp, G)[None, :]

    w1 = jnp.stack([fold_w(w) for w in params["w1"]]).astype(jnp.bfloat16)
    w2 = jnp.stack([fold_w(w) for w in params["w2"]]).astype(jnp.bfloat16)
    b1 = jnp.stack([fold_b(b) for b in params["b1"]]).astype(jnp.float32)
    b2 = jnp.stack([fold_b(b) for b in params["b2"]]).astype(jnp.float32)

    wf_p = jnp.zeros((S, d_out), jnp.float32).at[:layers[-2], :].set(params["wf"])
    wf = jnp.kron(eye_g, wf_p).astype(jnp.bfloat16)              # (F, No)
    bf = jnp.tile(params["bf"], G)[None, :].astype(jnp.float32)  # (1, No)

    # ---- batch tiling over folded rows -------------------------------------
    B = x.shape[0]
    Bf = -(-B // G)                                   # folded rows needed
    tbf_target = max(batch_tile // G, 8)              # big tiles amortize step overhead
    n_steps = max(2, -(-Bf // tbf_target))            # >=2 steps -> both v7x TCs busy
    TBf = max(_round_up(-(-Bf // n_steps), 8), 8)
    Bfp = _round_up(Bf, TBf)

    # Folded input: sample (r*G + g) occupies lanes [g*S, g*S + d_in) of row r.
    xpad = jnp.zeros((Bfp * G, d_in), jnp.float32).at[:B].set(x.astype(jnp.float32))
    xp = jnp.pad(xpad.reshape(Bfp, G, d_in),
                 ((0, 0), (0, 0), (0, S - d_in))).reshape(Bfp, F)

    kernel = functools.partial(_mlp_kernel, act_dtype=act_dtype)

    out = pl.pallas_call(
        kernel,
        out_shape=jax.ShapeDtypeStruct((Bfp, No), jnp.float32),
        grid=(Bfp // TBf,),
        in_specs=[
            # Weights / biases: full-array blocks with constant index maps ->
            # DMA'd once, kept VMEM-resident across the batch grid.
            # (Scaling guard: if F / n_blocks ever grow large, add
            #  pipeline_mode=pl.Buffered(1) on the weight specs and re-derive
            #  vmem_limit_bytes against v7x's 64 MiB physical VMEM.)
            pl.BlockSpec((n_blocks, F, F), lambda b: (0, 0, 0)),
            pl.BlockSpec((n_blocks, 1, F), lambda b: (0, 0, 0)),
            pl.BlockSpec((n_blocks, F, F), lambda b: (0, 0, 0)),
            pl.BlockSpec((n_blocks, 1, F), lambda b: (0, 0, 0)),
            pl.BlockSpec((F, No), lambda b: (0, 0)),
            pl.BlockSpec((1, No), lambda b: (0, 0)),
            # Activations: tiled over folded batch rows only.
            pl.BlockSpec((TBf, F), lambda b: (b, 0)),
        ],
        out_specs=pl.BlockSpec((TBf, No), lambda b: (b, 0)),
        compiler_params=pltpu.CompilerParams(
            dimension_semantics=("parallel",),     # shard batch across TCs (v7x)
            vmem_limit_bytes=32 * 1024 * 1024,     # small footprint; safe on v5e/v6e/v7x
        ),
    )(w1, b1, w2, b2, wf, bf, xp)

    # Unfold: row r, lane chunk g holds sample (r*G + g)'s d_out outputs.
    return out.reshape(Bfp * G, d_out)[:B]


# ----------------------------------------------------------------------------
# Pure-JAX reference (mirrors the PyTorch forward) + PyTorch-style init.
# ----------------------------------------------------------------------------
def net_forward_reference(params, x, layers):
    n_blocks = len(layers) - 2
    x = x.astype(jnp.float32)
    for i in range(n_blocks):
        h = jnp.sin(x @ params["w1"][i] + params["b1"][i])
        h = jnp.sin(h @ params["w2"][i] + params["b2"][i])
        x = h + jnp.pad(x, ((0, 0), (0, layers[i + 1] - layers[i])))
    return x @ params["wf"] + params["bf"]


def init_params(key, layers):
    n_blocks = len(layers) - 2
    params = {"w1": [], "b1": [], "w2": [], "b2": []}

    def linear(key, fan_in, fan_out):
        k1, k2 = jax.random.split(key)
        bound = float(fan_in) ** -0.5
        w = jax.random.uniform(k1, (fan_in, fan_out), jnp.float32, -bound, bound)
        b = jax.random.uniform(k2, (fan_out,), jnp.float32, -bound, bound)
        return w, b

    for i in range(n_blocks):
        key, k1, k2 = jax.random.split(key, 3)
        w, b = linear(k1, layers[i], layers[i + 1])
        params["w1"].append(w)
        params["b1"].append(b)
        w, b = linear(k2, layers[i + 1], layers[i + 1])
        params["w2"].append(w)
        params["b2"].append(b)
    key, kf = jax.random.split(key)
    params["wf"], params["bf"] = linear(kf, layers[-2], layers[-1])
    return params


if __name__ == "__main__":
    layers = [2, 32, 32, 32, 1]   # in=2, three hidden blocks of width 32, out=1
    batch = 64

    key = jax.random.PRNGKey(0)
    kp, kx = jax.random.split(key)
    params = init_params(kp, layers)
    x = jax.random.normal(kx, (batch, layers[0]), jnp.float32)

    out = net_forward_pallas(params, x, layers)
    out = jax.block_until_ready(out)

    ref = net_forward_reference(params, x, layers)
    assert out.shape == (batch, layers[-1])
    err = float(jnp.max(jnp.abs(out - ref)))
    # bf16 MXU matmuls with f32 accumulation -> loose tolerance vs f32 reference.
    assert err < 1e-1, f"max abs err {err}"

    print("KERNEL_OK")
</pallas_src>

<mosaic_0001>
module attributes {stable_mosaic.version = 11 : i64} {
  func.func @_mlp_kernel(%arg0: i32, %arg1: memref<3x128x128xbf16, #tpu.memory_space<vmem>>, %arg2: memref<3x1x128xf32, #tpu.memory_space<vmem>>, %arg3: memref<3x128x128xbf16, #tpu.memory_space<vmem>>, %arg4: memref<3x1x128xf32, #tpu.memory_space<vmem>>, %arg5: memref<128x4xbf16, #tpu.memory_space<vmem>>, %arg6: memref<1x4xf32, #tpu.memory_space<vmem>>, %arg7: memref<8x128xf32, #tpu.memory_space<vmem>>, %arg8: memref<8x4xf32, #tpu.memory_space<vmem>>) attributes {dimension_semantics = [#tpu.dimension_semantics<parallel>], iteration_bounds = array<i64: 2>, scalar_prefetch = 0 : i64, scratch_operands = 0 : i64, tpu.core_type = #tpu.core_type<tc>, window_params = [{pipeline_mode = #tpu.pipeline_mode<synchronous>, transform_indices = @transform_0, window_bounds = array<i64: 3, 128, 128>}, {pipeline_mode = #tpu.pipeline_mode<synchronous>, transform_indices = @transform_1, window_bounds = array<i64: 3, 1, 128>}, {pipeline_mode = #tpu.pipeline_mode<synchronous>, transform_indices = @transform_2, window_bounds = array<i64: 3, 128, 128>}, {pipeline_mode = #tpu.pipeline_mode<synchronous>, transform_indices = @transform_3, window_bounds = array<i64: 3, 1, 128>}, {pipeline_mode = #tpu.pipeline_mode<synchronous>, transform_indices = @transform_4, window_bounds = array<i64: 128, 4>}, {pipeline_mode = #tpu.pipeline_mode<synchronous>, transform_indices = @transform_5, window_bounds = array<i64: 1, 4>}, {transform_indices = @transform_6, window_bounds = array<i64: 8, 128>}, {transform_indices = @transform_7, window_bounds = array<i64: 8, 4>}]} {
    %c0 = arith.constant 0 : index
    %c0_0 = arith.constant 0 : index
    %0 = vector.load %arg7[%c0, %c0_0] : memref<8x128xf32, #tpu.memory_space<vmem>>, vector<8x128xf32>
    %c0_i32 = arith.constant 0 : i32
    %1 = arith.truncf %0 : vector<8x128xf32> to vector<8x128xbf16>
    %2 = arith.index_cast %c0_i32 : i32 to index
    %c0_1 = arith.constant 0 : index
    %c0_2 = arith.constant 0 : index
    %3 = vector.load %arg1[%2, %c0_1, %c0_2] : memref<3x128x128xbf16, #tpu.memory_space<vmem>>, vector<1x128x128xbf16>
    %4 = vector.shape_cast %3 : vector<1x128x128xbf16> to vector<128x128xbf16>
    %cst = arith.constant dense<0.000000e+00> : vector<8x128xf32>
    %5 = tpu.matmul %1, %4, %cst {dimension_numbers = #tpu.dot_dimension_numbers<[1], [0], [0], [1], [0, 0, 1, 1], [], []>} : vector<8x128xbf16>, vector<128x128xbf16>, vector<8x128xf32> -> vector<8x128xf32>
    %6 = arith.index_cast %c0_i32 : i32 to index
    %c0_3 = arith.constant 0 : index
    %c0_4 = arith.constant 0 : index
    %7 = vector.load %arg2[%6, %c0_3, %c0_4] : memref<3x1x128xf32, #tpu.memory_space<vmem>>, vector<1x1x128xf32>
    %8 = vector.shape_cast %7 : vector<1x1x128xf32> to vector<1x128xf32>
    %9 = vector.broadcast %8 : vector<1x128xf32> to vector<8x128xf32>
    %10 = arith.addf %5, %9 : vector<8x128xf32>
    %11 = math.sin %10 : vector<8x128xf32>
    %12 = arith.truncf %11 : vector<8x128xf32> to vector<8x128xbf16>
    %13 = arith.index_cast %c0_i32 : i32 to index
    %c0_5 = arith.constant 0 : index
    %c0_6 = arith.constant 0 : index
    %14 = vector.load %arg3[%13, %c0_5, %c0_6] : memref<3x128x128xbf16, #tpu.memory_space<vmem>>, vector<1x128x128xbf16>
    %15 = vector.shape_cast %14 : vector<1x128x128xbf16> to vector<128x128xbf16>
    %cst_7 = arith.constant dense<0.000000e+00> : vector<8x128xf32>
    %16 = tpu.matmul %12, %15, %cst_7 {dimension_numbers = #tpu.dot_dimension_numbers<[1], [0], [0], [1], [0, 0, 1, 1], [], []>} : vector<8x128xbf16>, vector<128x128xbf16>, vector<8x128xf32> -> vector<8x128xf32>
    %17 = arith.index_cast %c0_i32 : i32 to index
    %c0_8 = arith.constant 0 : index
    %c0_9 = arith.constant 0 : index
    %18 = vector.load %arg4[%17, %c0_8, %c0_9] : memref<3x1x128xf32, #tpu.memory_space<vmem>>, vector<1x1x128xf32>
    %19 = vector.shape_cast %18 : vector<1x1x128xf32> to vector<1x128xf32>
    %20 = vector.broadcast %19 : vector<1x128xf32> to vector<8x128xf32>
    %21 = arith.addf %16, %20 : vector<8x128xf32>
    %22 = math.sin %21 : vector<8x128xf32>
    %23 = arith.addf %22, %0 : vector<8x128xf32>
    %c1_i32 = arith.constant 1 : i32
    %24 = arith.truncf %23 : vector<8x128xf32> to vector<8x128xbf16>
    %25 = arith.index_cast %c1_i32 : i32 to index
    %c0_10 = arith.constant 0 : index
    %c0_11 = arith.constant 0 : index
    %26 = vector.load %arg1[%25, %c0_10, %c0_11] : memref<3x128x128xbf16, #tpu.memory_space<vmem>>, vector<1x128x128xbf16>
    %27 = vector.shape_cast %26 : vector<1x128x128xbf16> to vector<128x128xbf16>
    %cst_12 = arith.constant dense<0.000000e+00> : vector<8x128xf32>
    %28 = tpu.matmul %24, %27, %cst_12 {dimension_numbers = #tpu.dot_dimension_numbers<[1], [0], [0], [1], [0, 0, 1, 1], [], []>} : vector<8x128xbf16>, vector<128x128xbf16>, vector<8x128xf32> -> vector<8x128xf32>
    %29 = arith.index_cast %c1_i32 : i32 to index
    %c0_13 = arith.constant 0 : index
    %c0_14 = arith.constant 0 : index
    %30 = vector.load %arg2[%29, %c0_13, %c0_14] : memref<3x1x128xf32, #tpu.memory_space<vmem>>, vector<1x1x128xf32>
    %31 = vector.shape_cast %30 : vector<1x1x128xf32> to vector<1x128xf32>
    %32 = vector.broadcast %31 : vector<1x128xf32> to vector<8x128xf32>
    %33 = arith.addf %28, %32 : vector<8x128xf32>
    %34 = math.sin %33 : vector<8x128xf32>
    %35 = arith.truncf %34 : vector<8x128xf32> to vector<8x128xbf16>
    %36 = arith.index_cast %c1_i32 : i32 to index
    %c0_15 = arith.constant 0 : index
    %c0_16 = arith.constant 0 : index
    %37 = vector.load %arg3[%36, %c0_15, %c0_16] : memref<3x128x128xbf16, #tpu.memory_space<vmem>>, vector<1x128x128xbf16>
    %38 = vector.shape_cast %37 : vector<1x128x128xbf16> to vector<128x128xbf16>
    %cst_17 = arith.constant dense<0.000000e+00> : vector<8x128xf32>
    %39 = tpu.matmul %35, %38, %cst_17 {dimension_numbers = #tpu.dot_dimension_numbers<[1], [0], [0], [1], [0, 0, 1, 1], [], []>} : vector<8x128xbf16>, vector<128x128xbf16>, vector<8x128xf32> -> vector<8x128xf32>
    %40 = arith.index_cast %c1_i32 : i32 to index
    %c0_18 = arith.constant 0 : index
    %c0_19 = arith.constant 0 : index
    %41 = vector.load %arg4[%40, %c0_18, %c0_19] : memref<3x1x128xf32, #tpu.memory_space<vmem>>, vector<1x1x128xf32>
    %42 = vector.shape_cast %41 : vector<1x1x128xf32> to vector<1x128xf32>
    %43 = vector.broadcast %42 : vector<1x128xf32> to vector<8x128xf32>
    %44 = arith.addf %39, %43 : vector<8x128xf32>
    %45 = math.sin %44 : vector<8x128xf32>
    %46 = arith.addf %45, %23 : vector<8x128xf32>
    %c2_i32 = arith.constant 2 : i32
    %47 = arith.truncf %46 : vector<8x128xf32> to vector<8x128xbf16>
    %48 = arith.index_cast %c2_i32 : i32 to index
    %c0_20 = arith.constant 0 : index
    %c0_21 = arith.constant 0 : index
    %49 = vector.load %arg1[%48, %c0_20, %c0_21] : memref<3x128x128xbf16, #tpu.memory_space<vmem>>, vector<1x128x128xbf16>
    %50 = vector.shape_cast %49 : vector<1x128x128xbf16> to vector<128x128xbf16>
    %cst_22 = arith.constant dense<0.000000e+00> : vector<8x128xf32>
    %51 = tpu.matmul %47, %50, %cst_22 {dimension_numbers = #tpu.dot_dimension_numbers<[1], [0], [0], [1], [0, 0, 1, 1], [], []>} : vector<8x128xbf16>, vector<128x128xbf16>, vector<8x128xf32> -> vector<8x128xf32>
    %52 = arith.index_cast %c2_i32 : i32 to index
    %c0_23 = arith.constant 0 : index
    %c0_24 = arith.constant 0 : index
    %53 = vector.load %arg2[%52, %c0_23, %c0_24] : memref<3x1x128xf32, #tpu.memory_space<vmem>>, vector<1x1x128xf32>
    %54 = vector.shape_cast %53 : vector<1x1x128xf32> to vector<1x128xf32>
    %55 = vector.broadcast %54 : vector<1x128xf32> to vector<8x128xf32>
    %56 = arith.addf %51, %55 : vector<8x128xf32>
    %57 = math.sin %56 : vector<8x128xf32>
    %58 = arith.truncf %57 : vector<8x128xf32> to vector<8x128xbf16>
    %59 = arith.index_cast %c2_i32 : i32 to index
    %c0_25 = arith.constant 0 : index
    %c0_26 = arith.constant 0 : index
    %60 = vector.load %arg3[%59, %c0_25, %c0_26] : memref<3x128x128xbf16, #tpu.memory_space<vmem>>, vector<1x128x128xbf16>
    %61 = vector.shape_cast %60 : vector<1x128x128xbf16> to vector<128x128xbf16>
    %cst_27 = arith.constant dense<0.000000e+00> : vector<8x128xf32>
    %62 = tpu.matmul %58, %61, %cst_27 {dimension_numbers = #tpu.dot_dimension_numbers<[1], [0], [0], [1], [0, 0, 1, 1], [], []>} : vector<8x128xbf16>, vector<128x128xbf16>, vector<8x128xf32> -> vector<8x128xf32>
    %63 = arith.index_cast %c2_i32 : i32 to index
    %c0_28 = arith.constant 0 : index
    %c0_29 = arith.constant 0 : index
    %64 = vector.load %arg4[%63, %c0_28, %c0_29] : memref<3x1x128xf32, #tpu.memory_space<vmem>>, vector<1x1x128xf32>
    %65 = vector.shape_cast %64 : vector<1x1x128xf32> to vector<1x128xf32>
    %66 = vector.broadcast %65 : vector<1x128xf32> to vector<8x128xf32>
    %67 = arith.addf %62, %66 : vector<8x128xf32>
    %68 = math.sin %67 : vector<8x128xf32>
    %69 = arith.addf %68, %46 : vector<8x128xf32>
    %c3_i32 = arith.constant 3 : i32
    %70 = arith.truncf %69 : vector<8x128xf32> to vector<8x128xbf16>
    %c0_30 = arith.constant 0 : index
    %c0_31 = arith.constant 0 : index
    %71 = vector.load %arg5[%c0_30, %c0_31] : memref<128x4xbf16, #tpu.memory_space<vmem>>, vector<128x4xbf16>
    %cst_32 = arith.constant dense<0.000000e+00> : vector<8x4xf32>
    %72 = tpu.matmul %70, %71, %cst_32 {dimension_numbers = #tpu.dot_dimension_numbers<[1], [0], [0], [1], [0, 0, 1, 1], [], []>} : vector<8x128xbf16>, vector<128x4xbf16>, vector<8x4xf32> -> vector<8x4xf32>
    %c0_33 = arith.constant 0 : index
    %c0_34 = arith.constant 0 : index
    %73 = vector.load %arg6[%c0_33, %c0_34] : memref<1x4xf32, #tpu.memory_space<vmem>>, vector<1x4xf32>
    %74 = vector.broadcast %73 : vector<1x4xf32> to vector<8x4xf32>
    %75 = arith.addf %72, %74 : vector<8x4xf32>
    %c0_35 = arith.constant 0 : index
    %c0_36 = arith.constant 0 : index
    %76 = vector.load %arg8[%c0_35, %c0_36] : memref<8x4xf32, #tpu.memory_space<vmem>>, vector<8x4xf32>
    tpu.vector_store %arg8[%c0_35, %c0_36], %75 {strides = array<i32>} : memref<8x4xf32, #tpu.memory_space<vmem>>, vector<8x4xf32>,
    return
  }
  func.func @transform_0(%arg0: i32) -> (i32, i32, i32) {
    %c0_i32 = arith.constant 0 : i32
    %c0_i32_0 = arith.constant 0 : i32
    %c0_i32_1 = arith.constant 0 : i32
    %c0_i32_2 = arith.constant 0 : i32
    return %c0_i32, %c0_i32_0, %c0_i32_1 : i32, i32, i32
  }
  func.func @transform_1(%arg0: i32) -> (i32, i32, i32) {
    %c0_i32 = arith.constant 0 : i32
    %c0_i32_0 = arith.constant 0 : i32
    %c0_i32_1 = arith.constant 0 : i32
    %c0_i32_2 = arith.constant 0 : i32
    return %c0_i32, %c0_i32_0, %c0_i32_1 : i32, i32, i32
  }
  func.func @transform_2(%arg0: i32) -> (i32, i32, i32) {
    %c0_i32 = arith.constant 0 : i32
    %c0_i32_0 = arith.constant 0 : i32
    %c0_i32_1 = arith.constant 0 : i32
    %c0_i32_2 = arith.constant 0 : i32
    return %c0_i32, %c0_i32_0, %c0_i32_1 : i32, i32, i32
  }
  func.func @transform_3(%arg0: i32) -> (i32, i32, i32) {
    %c0_i32 = arith.constant 0 : i32
    %c0_i32_0 = arith.constant 0 : i32
    %c0_i32_1 = arith.constant 0 : i32
    %c0_i32_2 = arith.constant 0 : i32
    return %c0_i32, %c0_i32_0, %c0_i32_1 : i32, i32, i32
  }
  func.func @transform_4(%arg0: i32) -> (i32, i32) {
    %c0_i32 = arith.constant 0 : i32
    %c0_i32_0 = arith.constant 0 : i32
    %c0_i32_1 = arith.constant 0 : i32
    return %c0_i32, %c0_i32_0 : i32, i32
  }
  func.func @transform_5(%arg0: i32) -> (i32, i32) {
    %c0_i32 = arith.constant 0 : i32
    %c0_i32_0 = arith.constant 0 : i32
    %c0_i32_1 = arith.constant 0 : i32
    return %c0_i32, %c0_i32_0 : i32, i32
  }
  func.func @transform_6(%arg0: i32) -> (i32, i32) {
    %c0_i32 = arith.constant 0 : i32
    %c0_i32_0 = arith.constant 0 : i32
    return %arg0, %c0_i32 : i32, i32
  }
  func.func @transform_7(%arg0: i32) -> (i32, i32) {
    %c0_i32 = arith.constant 0 : i32
    %c0_i32_0 = arith.constant 0 : i32
    return %arg0, %c0_i32 : i32, i32
  }
}

</mosaic_0001>

<bundles_post_ra>
// kernel: tpu_custom_call.1
= control target key start
LH: loop header
LB: loop body
LE: loop exit
PB: predicated region body
PF: predicated region fallthrough
CT: control target
= control target key end

     0   :  { %12 = vsyncpa [#allocation3], 0  ;;  %s2798_s0 = inlined_call_operand.hbm [shape: bf16[3,128,128], index: 0, kind: input, shape index: {}]   ;;  %s2799_s1 = inlined_call_operand.vmem [shape: f32[3,1,128], index: 1, kind: input, shape index: {}]   ;;  %s2800_s2 = inlined_call_operand.hbm [shape: bf16[3,128,128], index: 2, kind: input, shape index: {}]   ;;  %s2801_s3 = inlined_call_operand.vmem [shape: f32[3,1,128], index: 3, kind: input, shape index: {}]   ;;  %s2802_s4 = inlined_call_operand.vmem [shape: bf16[128,4], index: 4, kind: input, shape index: {}]   ;;  %s2803_s5 = inlined_call_operand.vmem [shape: f32[1,4], index: 5, kind: input, shape index: {}]   ;;  %s2804_s6 = inlined_call_operand.vmem [shape: f32[16,128], index: 6, kind: input, shape index: {}]   ;;  %s2805_s7 = inlined_call_operand.vmem [shape: f32[16,4], index: 7, kind: output, shape index: {}]  }
   0x1   :  { %13 = vsyncpa [#allocation5], 0  ;;  %s2376_s24 = smov 0  }
   0x2 LB: > { %s2382_s25 = sadd.s32 4294967295, %s2322_s24   ;;  %p1804_p0 = scmp.ge.s32.totalorder %s2322_s24, 1  ;;  %s2322_s24 = sphi %s2376_s24, %s19_s24  }
   0x3   : > { %p202_p1 = scmp.lt.s32.totalorder %s2322_s24, 3  ;;  %s2324_s26 = smov [#allocation2]  }
   0x4   : > { %s214_s27 = sshll.u32 %s2324_s26, 4  ;;  %p2806_p3 = scmp.eq.s32.totalorder %s2382_s25, 0  ;;  %s215_s27 = int_to_ptr.vmem [resolvable:$true] %s214_s27 }
   0x5   : > { %p2386_p2 = pnand %p1804_p0, %p202_p1  ;;  %s2325_s29 = smov [#allocation4]  }
   0x6   : > { %s230_s30 = sshll.u32 %s2325_s29, 4  ;;  %s2252_s11 = scalar_lea.hbm %s2798_s0, 3072  ;;  %s2399_s30 = int_to_ptr.vmem [resolvable:$true] %s230_s30 }
   0x7   : > { %s2808_s28 = scalar_select %p2386_p2, 1, 0 }
   0x8   : > { %p2141_p4 = pneg %p2386_p2  ;;  %p2253_p6 = scmp.ne.s32.totalorder %s2798_s0, %s2252_s11 }
   0x9   : > { %p2259_p10 = scmp.lt.u32.totalorder %s2252_s11, %s2798_s0 }
   0xa   : > { %p2395_p5 = pnand %p2806_p3, %p2141_p4 }
   0xc   : > { %p2254_p7 = pneg %p2395_p5 }
   0xe   : > { %p2255_p8 = pnand %p2254_p7, %p2253_p6 }
  0x10   : > { %p2256_p9 = pneg %p2255_p8 }
  0x12   : > { %p2261_p11 = pnand %p2259_p10, %p2256_p9 }
  0x14   : > { %2264 = shalt.err (!%p2261_p11)
}
  0x15   : > { %s2265_s16 = scalar_lea.vmem %s215_s27, 3072  ;;  %p2273_p1 = scmp.lt.s32.totalorder %s215_s27, %s215_s27 }
  0x16   : > { %p2266_p12 = scmp.ne.s32.totalorder %s215_s27, %s2265_s16  ;;  %p2274_p4 = scmp.lt.s32.totalorder %s2265_s16, %s2265_s16 }
  0x18   : > { %p2268_p13 = pnand %p2266_p12, %p2254_p7  ;;  %p2275_p3 = por %p2274_p4, %p2273_p1 }
  0x1a   : > { %p2269_p0 = pneg %p2268_p13 }
  0x1c   : > { %p2276_p2 = pnand %p2275_p3, %p2269_p0 }
  0x1e   : > { %2279 = shalt.err (!%p2276_p2)
}
  0x1f   : > { %s2326_s17 = smov 64   ;;  %s2327_s18 = smov 4  }
  0x20   : > { %2144 = dma.hbm_to_vmem [thread:$0]  (!%p2395_p5), %s2798_s0, 3072, %s215_s27, [#allocation3], %s2326_s17, %s2326_s17, %s2327_s18  }
  0x21   : > { %s2280_s23 = scalar_lea.hbm %s2800_s2, 3072 }
  0x22   : > { %p2281_p6 = scmp.ne.s32.totalorder %s2800_s2, %s2280_s23  ;;  %p2287_p8 = scmp.lt.u32.totalorder %s2280_s23, %s2800_s2 }
  0x24   : > { %p2283_p2 = pnand %p2281_p6, %p2254_p7 }
  0x26   : > { %p2284_p3 = pneg %p2283_p2 }
  0x28   : > { %p2289_p9 = pnand %p2287_p8, %p2284_p3 }
  0x2a   : > { %2292 = shalt.err (!%p2289_p9)
}
  0x2b   : > { %s2293_s27 = scalar_lea.vmem %s2399_s30, 3072  ;;  %p2301_p13 = scmp.lt.s32.totalorder %s2399_s30, %s2399_s30 }
  0x2c   : > { %p2294_p10 = scmp.ne.s32.totalorder %s2399_s30, %s2293_s27  ;;  %p2302_p0 = scmp.lt.s32.totalorder %s2293_s27, %s2293_s27 }
  0x2e   : > { %p2296_p11 = pnand %p2294_p10, %p2254_p7  ;;  %p2303_p1 = por %p2302_p0, %p2301_p13 }
  0x30   : > { %p2297_p12 = pneg %p2296_p11 }
  0x32   : > { %p2304_p4 = pnand %p2303_p1, %p2297_p12 }
  0x34   : > { %2307 = shalt.err (!%p2304_p4)
}
  0x35   : > { %2147 = dma.hbm_to_vmem [thread:$0]  (!%p2395_p5), %s2800_s2, 3072, %s2399_s30, [#allocation5], %s2326_s17, %s2326_s17, %s2327_s18  }
  0x36   : > { %p2810_p6 = scmp.ne.s32.totalorder %s2808_s28, 0 }
  0x37   : > { %p2811_p2 = scmp.eq.s32.totalorder (!%p2810_p6), %s2382_s25, 0 }
  0x38   : > { %262 = sbr.rel (%p2810_p6) target bundleno = 2092 (0x82c), region = 48 }
  0x3f   : > { %2313 = dma.done.wait (%p2811_p2), [#allocation3], 3072   ;;  %p2812_p7 = pmov %p2811_p2 }
  0x40   : > { %p2813_p3 = pmov %p2811_p2 }
  0x41   : > { %2315 = vsyncadd (%p2812_p7), [#allocation3], 4294964224 }
  0x42   : > { %2317 = dma.done.wait (%p2813_p3), [#allocation5], 3072   ;;  %p2814_p8 = pmov %p2811_p2 }
  0x43   : > { %v2328_v0 = vmov 0.0   ;;  %vm2329_vm0 = vmmov 0   ;;  %v2172_v1 = vld [vmem:[#allocation2] sm:$0xff]   ;;  %p296_p5 = scmp.lt.s32.totalorder %s2382_s25, 1  ;;  %v2173_v2 = vld [vmem:[#allocation2 + $0x8] sm:$0xff]   ;;  %v2174_v3 = vld [vmem:[#allocation2 + $0x10] sm:$0xff]  }
  0x44   : > { %2319 = vsyncadd (%p2814_p8), [#allocation5], 4294964224  ;;  %1969 = vmatprep.subr.bf16.mxu0 %v2328_v0  ;;  %1985 = vmatprep.mubr.msk.bf16.mxu0 %vm2329_vm0, %v2328_v0  ;;  %v2175_v4 = vld [vmem:[#allocation2 + $0x18] sm:$0xff]   ;;  %v2176_v5 = vld [vmem:[#allocation2 + $0x20] sm:$0xff]   ;;  %v2330_v35 = vmov 683565275  }
  0x45   : > { %1989 = vmatprep.subr.bf16.mxu1 %v2328_v0  ;;  %2005 = vmatprep.mubr.msk.bf16.mxu1 %vm2329_vm0, %v2328_v0  ;;  %s2816_s25 = smov (!%p296_p5, %s2382_s25), 1  ;;  %v2177_v6 = vld [vmem:[#allocation2 + $0x28] sm:$0xff]   ;;  %v2178_v7 = vld [vmem:[#allocation2 + $0x30] sm:$0xff]   ;;  %v2179_v8 = vld [vmem:[#allocation2 + $0x38] sm:$0xff]   ;;  %v2331_v37 = vmov 2475754826  }
  0x46   : > { %1970 = vmatpush3.bf16.msra.mxu0 %v2172_v1  ;;  %s1811_s28 = sshll.u32 %s2816_s25, 3  ;;  %v2180_v11 = vld [vmem:[#allocation4] sm:$0xff]   ;;  %v2181_v12 = vld [vmem:[#allocation4 + $0x8] sm:$0xff]   ;;  %v2182_v13 = vld [vmem:[#allocation4 + $0x10] sm:$0xff]   ;;  %v2332_v40 = vmov 2131351028  }
  0x47   : > { %1971 = vmatprep.subr.bf16.mxu0 %v2328_v0  ;;  %s299_s13 = scalar_lea.vmem %s2804_s6, %s1811_s28  ;;  %1990 = vmatpush3.bf16.msra.mxu1 %v2180_v11  ;;  %v2183_v14 = vld [vmem:[#allocation4 + $0x18] sm:$0xff]   ;;  %v2184_v15 = vld [vmem:[#allocation4 + $0x20] sm:$0xff]   ;;  %v2185_v16 = vld [vmem:[#allocation4 + $0x28] sm:$0xff]   ;;  %v2333_v43 = vmov 2102212464   ;;  %s303_s9 = scalar_lea.vmem %s2805_s7, %s1811_s28 }
  0x48   : > { %v2480_v9 = vld [vmem:[%s299_s13] sm:$0xff]  ;;  %1991 = vmatprep.subr.bf16.mxu1 %v2328_v0  ;;  %v2186_v17 = vld [vmem:[#allocation4 + $0x30] sm:$0xff]   ;;  %v2187_v18 = vld [vmem:[#allocation4 + $0x38] sm:$0xff]   ;;  %v2334_v46 = vmov 920167782  }
  0x49   : > { %v306_v10 = vpack.c.bf16 %v2480_v9, %v2480_v9  ;;  %v1813_v19 = vld [vmem:[%s2799_s1] ss:$0 sm:$0xff]  ;;  %v2335_v49 = vmov 1326507024  }
  0x4a   : > { %1972 = vmatpush3.bf16.msra.mxu0 %v2173_v2 }
  0x4b   : > { %1973 = vmatprep.subr.bf16.mxu0 %v2328_v0  ;;  %1992 = vmatpush3.bf16.msra.mxu1 %v2181_v12 }
  0x4c   : > { %1993 = vmatprep.subr.bf16.mxu1 %v2328_v0 }
  0x4e   : > { %1974 = vmatpush3.bf16.msra.mxu0 %v2174_v3 }
  0x4f   : > { %1975 = vmatprep.subr.bf16.mxu0 %v2328_v0  ;;  %1994 = vmatpush3.bf16.msra.mxu1 %v2182_v13 }
  0x50   : > { %1995 = vmatprep.subr.bf16.mxu1 %v2328_v0 }
  0x52   : > { %1976 = vmatpush3.bf16.msra.mxu0 %v2175_v4 }
  0x53   : > { %1977 = vmatprep.subr.bf16.mxu0 %v2328_v0  ;;  %1996 = vmatpush3.bf16.msra.mxu1 %v2183_v14 }
  0x54   : > { %1997 = vmatprep.subr.bf16.mxu1 %v2328_v0 }
  0x56   : > { %1978 = vmatpush3.bf16.msra.mxu0 %v2176_v5 }
  0x57   : > { %1979 = vmatprep.subr.bf16.mxu0 %v2328_v0  ;;  %1998 = vmatpush3.bf16.msra.mxu1 %v2184_v15 }
  0x58   : > { %1999 = vmatprep.subr.bf16.mxu1 %v2328_v0 }
  0x5a   : > { %1980 = vmatpush3.bf16.msra.mxu0 %v2177_v6 }
  0x5b   : > { %1981 = vmatprep.subr.bf16.mxu0 %v2328_v0  ;;  %2000 = vmatpush3.bf16.msra.mxu1 %v2185_v16 }
  0x5c   : > { %2001 = vmatprep.subr.bf16.mxu1 %v2328_v0 }
  0x5e   : > { %1982 = vmatpush3.bf16.msra.mxu0 %v2178_v7 }
  0x5f   : > { %1983 = vmatprep.subr.bf16.mxu0 %v2328_v0  ;;  %2002 = vmatpush3.bf16.msra.mxu1 %v2186_v17 }
  0x60   : > { %2003 = vmatprep.subr.bf16.mxu1 %v2328_v0 }
  0x62   : > { %1984 = vmatpush3.bf16.msra.mxu0 %v2179_v8 }
  0x63   : > { %2009 = vmatprep.subr.bf16.mxu0 %v2328_v0  ;;  %2004 = vmatpush3.bf16.msra.mxu1 %v2187_v18 }
  0x64   : > { %2029 = vmatprep.subr.bf16.mxu1 %v2328_v0 }
  0x65   : > { %1986 = vmatmul.mubr.bf16.vlgmr.msra.gmra.mrb[0].mxu0 %v306_v10 }
  0x66   : > { %2025 = vmatprep.mubr.msk.bf16.mxu0 %vm2329_vm0, %v2328_v0 }
 0x138   : > { %v412_v20 = vpop.f32.mrb[0].mxu0 }
 0x139   : > { %v2499_v21 = vadd.f32 %v1813_v19, %v412_v20  ;;  %v1987_v22 = vpop.f32.mrb[1].mxu0 }
 0x13a   : > { %v415_v23 = vpop.f32.mrb[2].mxu0 }
 0x13b   : > { %v421_v24 = vand.u32 2139095040, %v2499_v21  ;;  %v1988_v25 = vpop.f32.mrb[3].mxu0  ;;  %v418_v29 = vand.u32 2147483647, %v2499_v21  ;;  %vm420_vm8 = vcmp.lt.s32.totalorder %v2499_v21, 0  ;;  %vm510_vm13 = vweird.f32 %v2499_v21 }
 0x13d   : > { %v422_v26 = vshrl.u32 %v421_v24, 23  ;;  %v425_v32 = vand.u32 8388607, %v418_v29  ;;  %vm419_vm9 = vcmp.le.f32.partialorder %v418_v29, 0.7853982 }
 0x13f   : > { %v1822_v27 = vadd.s32 4294967169, %v422_v26  ;;  %v426_v51 = vor.u32 8388608, %v425_v32 }
 0x141   : > { %v428_v28 = vadd.s32 1, %v1822_v27  ;;  %v466_v2 = vshll.u32 %v426_v51, 8 }
 0x143   : > { %vm429_vm1 = vcmp.gt.s32.totalorder %v428_v28, 0 }
 0x144   : > { %v430_v30 = vsel %vm429_vm1, %v428_v28, 0 }
 0x145   : > { %v432_v31 = vand.u32 31, %v430_v30  ;;  %v431_v34 = vshrl.u32 %v430_v30, 5 }
 0x147   : > { %v433_v33 = vsub.s32 32, %v432_v31  ;;  %v435_v36 = vshll.u32 %v2330_v35, %v432_v31  ;;  %v438_v38 = vshll.u32 %v2331_v37, %v432_v31  ;;  %v441_v42 = vshll.u32 %v2332_v40, %v432_v31 }
 0x148   : > { %v444_v45 = vshll.u32 %v2333_v43, %v432_v31  ;;  %v447_v48 = vshll.u32 %v2334_v46, %v432_v31  ;;  %vm450_vm2 = vcmp.lt.s32.totalorder %v431_v34, 1  ;;  %vm453_vm3 = vcmp.lt.s32.totalorder %v431_v34, 4 }
 0x149   : > { %v436_v39 = vshrl.u32 %v2331_v37, %v433_v33  ;;  %v439_v41 = vshrl.u32 %v2332_v40, %v433_v33  ;;  %v442_v44 = vshrl.u32 %v2333_v43, %v433_v33  ;;  %v445_v47 = vshrl.u32 %v2334_v46, %v433_v33 }
 0x14a   : > { %v448_v50 = vshrl.u32 %v2335_v49, %v433_v33  ;;  %v434_v60 = vshrl.u32 %v2330_v35, %v433_v33  ;;  %vm452_vm4 = vcmp.lt.s32.totalorder %v431_v34, 3  ;;  %vm451_vm5 = vcmp.lt.s32.totalorder %v431_v34, 2 }
 0x14b   : > { %v437_v52 = vor.u32 %v436_v39, %v435_v36  ;;  %v440_v53 = vor.u32 %v439_v41, %v438_v38  ;;  %v443_v54 = vor.u32 %v442_v44, %v441_v42  ;;  %v446_v55 = vor.u32 %v445_v47, %v444_v45 }
 0x14c   : > { %v449_v56 = vor.u32 %v448_v50, %v447_v48 }
 0x14d   : > { %v455_v57 = vsel %vm453_vm3, %v443_v54, 2102212464  ;;  %v458_v58 = vsel %vm450_vm2, %v437_v52, %v440_v53  ;;  %v462_v59 = vsel %vm450_vm2, %v440_v53, %v443_v54  ;;  %v459_v61 = vsel %vm453_vm3, %v446_v55, 920167782 }
 0x14e   : > { %v463_v62 = vsel %vm453_vm3, %v449_v56, 1326507024  ;;  %v460_v63 = vsel %vm452_vm4, %v443_v54, %v459_v61  ;;  %v454_v3 = vsel %vm450_vm2, %v434_v60, %v437_v52  ;;  %v456_v4 = vsel %vm452_vm4, %v440_v53, %v455_v57 }
 0x14f   : > { %v464_v1 = vsel %vm452_vm4, %v446_v55, %v463_v62  ;;  %v461_v5 = vsel %vm451_vm5, %v458_v58, %v460_v63  ;;  %v457_v12 = vsel %vm451_vm5, %v454_v3, %v456_v4  ;;  %v2188_v62 = vld [vmem:[#allocation2 + $0x40] sm:$0xff]   ;;  %v2189_v63 = vld [vmem:[#allocation2 + $0x48] sm:$0xff]   ;;  %v2194_v4 = vld [vmem:[#allocation2 + $0x70] sm:$0xff]  }
 0x150   : > { %v465_v6 = vsel %vm451_vm5, %v462_v59, %v464_v1  ;;  %v2519_v10 = vmul.u32.u64.low %v466_v2, %v461_v5  ;;  %v2520_v11 = vmul.u32.u64.high %v466_v2, %v461_v5, %v2519_v10  ;;  %v473_v14 = vmul.u32 %v466_v2, %v457_v12  ;;  %2010 = vmatpush3.bf16.msra.mxu0 %v2188_v62  ;;  %v2190_v1 = vld [vmem:[#allocation2 + $0x50] sm:$0xff]   ;;  %v2193_v3 = vld [vmem:[#allocation2 + $0x68] sm:$0xff]   ;;  %v2195_v5 = vld [vmem:[#allocation2 + $0x78] sm:$0xff]  }
 0x151   : > { %v2516_v7 = vmul.u32.u64.low %v466_v2, %v465_v6  ;;  %v2517_v8 = vmul.u32.u64.high %v466_v2, %v465_v6, %v2516_v7  ;;  %2011 = vmatprep.subr.bf16.mxu0 %v2328_v0  ;;  %v2192_v2 = vld [vmem:[#allocation2 + $0x60] sm:$0xff]  }
 0x152   : > { %v476_v13 = vadd.s32 1, %v2520_v11  ;;  %v1826_v6 = vld [vmem:[%s2801_s3] ss:$0 sm:$0xff] }
 0x153   : > { %vm475_vm6 = vc.u32 %v2517_v8, %v2519_v10  ;;  %v474_v27 = vadd.s32 %v2519_v10, %v2517_v8 }
 0x154   : > { %v477_v15 = vsel %vm475_vm6, %v476_v13, %v2520_v11  ;;  %2012 = vmatpush3.bf16.msra.mxu0 %v2189_v63 }
 0x155   : > { %v478_v16 = vadd.s32 %v477_v15, %v473_v14  ;;  %2013 = vmatprep.subr.bf16.mxu0 %v2328_v0 }
 0x157   : > { %v479_v17 = vadd.s32 536870912, %v478_v16 }
 0x158   : > { %2014 = vmatpush3.bf16.msra.mxu0 %v2190_v1 }
 0x159   : > { %v480_v18 = vshrl.u32 %v479_v17, 30  ;;  %2015 = vmatprep.subr.bf16.mxu0 %v2328_v0 }
 0x15b   : > { %v481_v19 = vshll.u32 %v480_v18, 30  ;;  %v504_v44 = vsub.s32 4, %v480_v18 }
 0x15d   : > { %v482_v20 = vsub.s32 %v478_v16, %v481_v19  ;;  %v505_v48 = vsel %vm420_vm8, %v504_v44, %v480_v18 }
 0x15e   : > { %v507_v51 = vsel %vm419_vm9, 0, %v505_v48 }
 0x15f   : > { %v484_v22 = vsub.s32 0, %v482_v20  ;;  %v511_v52 = vadd.s32 3, %v507_v51 }
 0x161   : > { %v1823_v23 = vmin.u32 %v484_v22, %v482_v20  ;;  %v512_v53 = vand.u32 3, %v511_v52 }
 0x163   : > { %v486_v24 = vclz %v1823_v23  ;;  %vm517_vm10 = vcmp.eq.s32.totalorder %v512_v53, 2  ;;  %vm514_vm11 = vcmp.eq.s32.totalorder %v512_v53, 0  ;;  %vm513_vm12 = vcmp.lt.s32.totalorder %v512_v53, 2 }
 0x165   : > { %v1824_v25 = vadd.s32 4294967294, %v486_v24 }
 0x167   : > { %vm1825_vm7 = vcmp.lt.s32.totalorder %v1824_v25, 0 }
 0x168   : > { %v489_v26 = vsel %vm1825_vm7, 0, %v1824_v25 }
 0x169   : > { %v490_v28 = vsub.s32 32, %v489_v26  ;;  %v494_v30 = vsub.s32 4294967266, %v489_v26  ;;  %v491_v31 = vshll.u32 %v482_v20, %v489_v26 }
 0x16b   : > { %v492_v32 = vshrl.u32 %v474_v27, %v490_v28  ;;  %v495_v33 = vadd.s32 127, %v494_v30 }
 0x16d   : > { %v493_v34 = vor.u32 %v492_v32, %v491_v31  ;;  %v496_v36 = vshll.u32 %v495_v33, 23 }
 0x16f   : > { %v497_v38 = vor.u32 4788187, %v496_v36  ;;  %v500_v41 = vcvt.s32.f32 %v493_v34 }
 0x171   : > { %v498_v39 = vand.u32 2147483647, %v497_v38 }
 0x173   : > { %v501_v42 = vmul.f32 %v500_v41, %v498_v39 }
 0x175   : > { %v502_v45 = vxor.u32 2147483648, %v501_v42 }
 0x177   : > { %v503_v47 = vsel %vm420_vm8, %v502_v45, %v501_v42 }
 0x178   : > { %v506_v50 = vsel %vm419_vm9, %v2499_v21, %v503_v47  ;;  %v2191_v21 = vld [vmem:[#allocation2 + $0x58] sm:$0xff]  }
 0x179   : > { %2228 = vcosq.f32 %v506_v50  ;;  %2016 = vmatpush3.bf16.msra.mxu0 %v2191_v21 }
 0x17a   : > { %2230 = vsinq.f32 %v506_v50  ;;  %2017 = vmatprep.subr.bf16.mxu0 %v2328_v0 }
 0x17d   : > { %2018 = vmatpush3.bf16.msra.mxu0 %v2192_v2 }
 0x17e   : > { %2019 = vmatprep.subr.bf16.mxu0 %v2328_v0 }
 0x181   : > { %2020 = vmatpush3.bf16.msra.mxu0 %v2193_v3 }
 0x182   : > { %2021 = vmatprep.subr.bf16.mxu0 %v2328_v0 }
 0x183   : > { %v2229_v54 = vpop.eup %2228 }
 0x184   : > { %v2231_v55 = vpop.eup %2230  ;;  %v518_v56 = vxor.u32 2147483648, %v2229_v54 }
 0x185   : > { %v515_v57 = vxor.u32 2147483648, %v2231_v55  ;;  %2022 = vmatpush3.bf16.msra.mxu0 %v2194_v4 }
 0x186   : > { %v519_v58 = vsel %vm517_vm10, %v518_v56, %v2231_v55  ;;  %2023 = vmatprep.subr.bf16.mxu0 %v2328_v0 }
 0x187   : > { %v516_v59 = vsel %vm514_vm11, %v2229_v54, %v515_v57 }
 0x188   : > { %v520_v29 = vsel %vm513_vm12, %v516_v59, %v519_v58 }
 0x189   : > { %v521_v60 = vsel %vm510_vm13, nan, %v520_v29  ;;  %2024 = vmatpush3.bf16.msra.mxu0 %v2195_v5 }
 0x18a   : > { %v522_v61 = vpack.c.bf16 %v521_v60, %v521_v60  ;;  %2049 = vmatprep.subr.bf16.mxu0 %v2328_v0 }
 0x18c   : > { %2006 = vmatmul.mubr.bf16.vlgmr.msra.gmra.mrb[0].mxu1 %v522_v61 }
 0x18d   : > { %2045 = vmatprep.mubr.msk.bf16.mxu1 %vm2329_vm0, %v2328_v0 }
 0x25f   : > { %v628_v7 = vpop.f32.mrb[0].mxu1 }
 0x260   : > { %v2544_v8 = vadd.f32 %v1826_v6, %v628_v7  ;;  %v2007_v10 = vpop.f32.mrb[1].mxu1 }
 0x261   : > { %v631_v11 = vpop.f32.mrb[2].mxu1 }
 0x262   : > { %v637_v12 = vand.u32 2139095040, %v2544_v8  ;;  %v2008_v13 = vpop.f32.mrb[3].mxu1  ;;  %v634_v17 = vand.u32 2147483647, %v2544_v8  ;;  %vm636_vm6 = vcmp.lt.s32.totalorder %v2544_v8, 0  ;;  %vm726_vm11 = vweird.f32 %v2544_v8 }
 0x264   : > { %v638_v14 = vshrl.u32 %v637_v12, 23  ;;  %v641_v20 = vand.u32 8388607, %v634_v17  ;;  %vm635_vm7 = vcmp.le.f32.partialorder %v634_v17, 0.7853982 }
 0x266   : > { %v1835_v15 = vadd.s32 4294967169, %v638_v14  ;;  %v642_v36 = vor.u32 8388608, %v641_v20 }
 0x268   : > { %v644_v16 = vadd.s32 1, %v1835_v15  ;;  %v682_v55 = vshll.u32 %v642_v36, 8 }
 0x26a   : > { %vm645_vm14 = vcmp.gt.s32.totalorder %v644_v16, 0 }
 0x26b   : > { %v646_v18 = vsel %vm645_vm14, %v644_v16, 0 }
 0x26c   : > { %v648_v19 = vand.u32 31, %v646_v18  ;;  %v647_v23 = vshrl.u32 %v646_v18, 5 }
 0x26e   : > { %v649_v22 = vsub.s32 32, %v648_v19  ;;  %v651_v24 = vshll.u32 %v2330_v35, %v648_v19  ;;  %v654_v25 = vshll.u32 %v2331_v37, %v648_v19  ;;  %v657_v28 = vshll.u32 %v2332_v40, %v648_v19 }
 0x26f   : > { %v660_v31 = vshll.u32 %v2333_v43, %v648_v19  ;;  %v663_v33 = vshll.u32 %v2334_v46, %v648_v19  ;;  %vm666_vm15 = vcmp.lt.s32.totalorder %v647_v23, 1  ;;  %vm669_vm1 = vcmp.lt.s32.totalorder %v647_v23, 4 }
 0x270   : > { %v652_v26 = vshrl.u32 %v2331_v37, %v649_v22  ;;  %v655_v27 = vshrl.u32 %v2332_v40, %v649_v22  ;;  %v658_v30 = vshrl.u32 %v2333_v43, %v649_v22  ;;  %v661_v32 = vshrl.u32 %v2334_v46, %v649_v22 }
 0x271   : > { %v664_v34 = vshrl.u32 %v2335_v49, %v649_v22  ;;  %v650_v50 = vshrl.u32 %v2330_v35, %v649_v22  ;;  %vm668_vm2 = vcmp.lt.s32.totalorder %v647_v23, 3  ;;  %vm667_vm3 = vcmp.lt.s32.totalorder %v647_v23, 2 }
 0x272   : > { %v653_v38 = vor.u32 %v652_v26, %v651_v24  ;;  %v656_v39 = vor.u32 %v655_v27, %v654_v25  ;;  %v659_v41 = vor.u32 %v658_v30, %v657_v28  ;;  %v662_v42 = vor.u32 %v661_v32, %v660_v31 }
 0x273   : > { %v665_v44 = vor.u32 %v664_v34, %v663_v33 }
 0x274   : > { %v671_v45 = vsel %vm669_vm1, %v659_v41, 2102212464  ;;  %v674_v47 = vsel %vm666_vm15, %v653_v38, %v656_v39  ;;  %v678_v48 = vsel %vm666_vm15, %v656_v39, %v659_v41  ;;  %v675_v51 = vsel %vm669_vm1, %v662_v42, 920167782 }
 0x275   : > { %v679_v52 = vsel %vm669_vm1, %v665_v44, 1326507024  ;;  %v676_v53 = vsel %vm668_vm2, %v659_v41, %v675_v51  ;;  %v670_v56 = vsel %vm666_vm15, %v650_v50, %v653_v38  ;;  %v672_v57 = vsel %vm668_vm2, %v656_v39, %v671_v45 }
 0x276   : > { %v680_v54 = vsel %vm668_vm2, %v662_v42, %v679_v52  ;;  %v677_v58 = vsel %vm667_vm3, %v674_v47, %v676_v53  ;;  %v673_v63 = vsel %vm667_vm3, %v670_v56, %v672_v57  ;;  %v2196_v53 = vld [vmem:[#allocation4 + $0x40] sm:$0xff]   ;;  %v2201_v56 = vld [vmem:[#allocation4 + $0x68] sm:$0xff]   ;;  %v2202_v57 = vld [vmem:[#allocation4 + $0x70] sm:$0xff]  }
 0x277   : > { %v681_v59 = vsel %vm667_vm3, %v678_v48, %v680_v54  ;;  %v2564_v61 = vmul.u32.u64.low %v682_v55, %v677_v58  ;;  %v2565_v62 = vmul.u32.u64.high %v682_v55, %v677_v58, %v2564_v61  ;;  %v689_v21 = vmul.u32 %v682_v55, %v673_v63  ;;  %2030 = vmatpush3.bf16.msra.mxu1 %v2196_v53  ;;  %v2197_v54 = vld [vmem:[#allocation4 + $0x48] sm:$0xff]   ;;  %v2203_v58 = vld [vmem:[#allocation4 + $0x78] sm:$0xff]  }
 0x278   : > { %v2561_v29 = vmul.u32.u64.low %v682_v55, %v681_v59  ;;  %v2562_v60 = vmul.u32.u64.high %v682_v55, %v681_v59, %v2561_v29  ;;  %2031 = vmatprep.subr.bf16.mxu1 %v2328_v0  ;;  %v2200_v55 = vld [vmem:[#allocation4 + $0x60] sm:$0xff]  }
 0x279   : > { %v692_v1 = vadd.s32 1, %v2565_v62  ;;  %v1840_v59 = vld [vmem:[%s2799_s1 + $0x1] ss:$0 sm:$0xff] }
 0x27a   : > { %vm691_vm4 = vc.u32 %v2562_v60, %v2564_v61  ;;  %v690_v15 = vadd.s32 %v2564_v61, %v2562_v60 }
 0x27b   : > { %v693_v2 = vsel %vm691_vm4, %v692_v1, %v2565_v62  ;;  %2032 = vmatpush3.bf16.msra.mxu1 %v2197_v54 }
 0x27c   : > { %v694_v3 = vadd.s32 %v693_v2, %v689_v21  ;;  %2033 = vmatprep.subr.bf16.mxu1 %v2328_v0 }
 0x27e   : > { %v695_v4 = vadd.s32 536870912, %v694_v3 }
 0x280   : > { %v696_v5 = vshrl.u32 %v695_v4, 30 }
 0x282   : > { %v697_v6 = vshll.u32 %v696_v5, 30  ;;  %v720_v30 = vsub.s32 4, %v696_v5 }
 0x284   : > { %v698_v7 = vsub.s32 %v694_v3, %v697_v6  ;;  %v721_v33 = vsel %vm636_vm6, %v720_v30, %v696_v5 }
 0x285   : > { %v723_v36 = vsel %vm635_vm7, 0, %v721_v33 }
 0x286   : > { %v700_v10 = vsub.s32 0, %v698_v7  ;;  %v727_v38 = vadd.s32 3, %v723_v36 }
 0x288   : > { %v1836_v11 = vmin.u32 %v700_v10, %v698_v7  ;;  %v728_v39 = vand.u32 3, %v727_v38 }
 0x28a   : > { %v702_v12 = vclz %v1836_v11  ;;  %vm733_vm8 = vcmp.eq.s32.totalorder %v728_v39, 2  ;;  %vm730_vm9 = vcmp.eq.s32.totalorder %v728_v39, 0  ;;  %vm729_vm10 = vcmp.lt.s32.totalorder %v728_v39, 2 }
 0x28c   : > { %v1837_v13 = vadd.s32 4294967294, %v702_v12 }
 0x28e   : > { %vm1838_vm5 = vcmp.lt.s32.totalorder %v1837_v13, 0 }
 0x28f   : > { %v705_v14 = vsel %vm1838_vm5, 0, %v1837_v13 }
 0x290   : > { %v706_v16 = vsub.s32 32, %v705_v14  ;;  %v710_v18 = vsub.s32 4294967266, %v705_v14  ;;  %v707_v19 = vshll.u32 %v698_v7, %v705_v14 }
 0x292   : > { %v708_v20 = vshrl.u32 %v690_v15, %v706_v16  ;;  %v711_v22 = vadd.s32 127, %v710_v18 }
 0x294   : > { %v709_v23 = vor.u32 %v708_v20, %v707_v19  ;;  %v712_v24 = vshll.u32 %v711_v22, 23 }
 0x296   : > { %v713_v25 = vor.u32 4788187, %v712_v24  ;;  %v716_v27 = vcvt.s32.f32 %v709_v23 }
 0x298   : > { %v714_v26 = vand.u32 2147483647, %v713_v25 }
 0x29a   : > { %v717_v28 = vmul.f32 %v716_v27, %v714_v26 }
 0x29c   : > { %v718_v31 = vxor.u32 2147483648, %v717_v28 }
 0x29e   : > { %v719_v32 = vsel %vm636_vm6, %v718_v31, %v717_v28 }
 0x29f   : > { %v722_v34 = vsel %vm635_vm7, %v2544_v8, %v719_v32  ;;  %v2198_v8 = vld [vmem:[#allocation4 + $0x50] sm:$0xff]  }
 0x2a0   : > { %2232 = vcosq.f32 %v722_v34  ;;  %2034 = vmatpush3.bf16.msra.mxu1 %v2198_v8 }
 0x2a1   : > { %2234 = vsinq.f32 %v722_v34  ;;  %2035 = vmatprep.subr.bf16.mxu1 %v2328_v0 }
 0x2aa   : > { %v2233_v41 = vpop.eup %2232 }
 0x2ab   : > { %v2235_v42 = vpop.eup %2234  ;;  %v734_v44 = vxor.u32 2147483648, %v2233_v41 }
 0x2ac   : > { %v731_v45 = vxor.u32 2147483648, %v2235_v42 }
 0x2ad   : > { %v735_v47 = vsel %vm733_vm8, %v734_v44, %v2235_v42 }
 0x2ae   : > { %v732_v48 = vsel %vm730_vm9, %v2233_v41, %v731_v45 }
 0x2af   : > { %v736_v17 = vsel %vm729_vm10, %v732_v48, %v735_v47 }
 0x2b0   : > { %v737_v50 = vsel %vm726_vm11, nan, %v736_v17 }
 0x2b1   : > { %v2577_v51 = vadd.f32 %v737_v50, %v2480_v9  ;;  %v2199_v9 = vld [vmem:[#allocation4 + $0x58] sm:$0xff]  }
 0x2b2   : > { %2036 = vmatpush3.bf16.msra.mxu1 %v2199_v9 }
 0x2b3   : > { %v739_v52 = vpack.c.bf16 %v2577_v51, %v2577_v51  ;;  %2037 = vmatprep.subr.bf16.mxu1 %v2328_v0 }
 0x2b5   : > { %2026 = vmatmul.mubr.bf16.vlgmr.msra.gmra.mrb[4].mxu0 %v739_v52 }
 0x2b6   : > { %2065 = vmatprep.mubr.msk.bf16.mxu0 %vm2329_vm0, %v2328_v0  ;;  %2038 = vmatpush3.bf16.msra.mxu1 %v2200_v55 }
 0x2b7   : > { %2039 = vmatprep.subr.bf16.mxu1 %v2328_v0 }
 0x2ba   : > { %2040 = vmatpush3.bf16.msra.mxu1 %v2201_v56 }
 0x2bb   : > { %2041 = vmatprep.subr.bf16.mxu1 %v2328_v0 }
 0x2be   : > { %2042 = vmatpush3.bf16.msra.mxu1 %v2202_v57 }
 0x2bf   : > { %2043 = vmatprep.subr.bf16.mxu1 %v2328_v0 }
 0x2c2   : > { %2044 = vmatpush3.bf16.msra.mxu1 %v2203_v58 }
 0x2c3   : > { %2069 = vmatprep.subr.bf16.mxu1 %v2328_v0 }
 0x388   : > { %v847_v29 = vpop.f32.mrb[4].mxu0 }
 0x389   : > { %v2594_v60 = vadd.f32 %v1840_v59, %v847_v29  ;;  %v2027_v61 = vpop.f32.mrb[5].mxu0 }
 0x38a   : > { %v850_v62 = vpop.f32.mrb[6].mxu0 }
 0x38b   : > { %v856_v63 = vand.u32 2139095040, %v2594_v60  ;;  %v2028_v1 = vpop.f32.mrb[7].mxu0  ;;  %v853_v4 = vand.u32 2147483647, %v2594_v60  ;;  %vm855_vm4 = vcmp.lt.s32.totalorder %v2594_v60, 0  ;;  %vm945_vm9 = vweird.f32 %v2594_v60 }
 0x38d   : > { %v857_v21 = vshrl.u32 %v856_v63, 23  ;;  %v860_v7 = vand.u32 8388607, %v853_v4  ;;  %vm854_vm5 = vcmp.le.f32.partialorder %v853_v4, 0.7853982 }
 0x38f   : > { %v1849_v2 = vadd.s32 4294967169, %v857_v21  ;;  %v861_v24 = vor.u32 8388608, %v860_v7 }
 0x391   : > { %v863_v3 = vadd.s32 1, %v1849_v2  ;;  %v901_v42 = vshll.u32 %v861_v24, 8 }
 0x393   : > { %vm864_vm12 = vcmp.gt.s32.totalorder %v863_v3, 0 }
 0x394   : > { %v865_v5 = vsel %vm864_vm12, %v863_v3, 0 }
 0x395   : > { %v867_v6 = vand.u32 31, %v865_v5  ;;  %v866_v11 = vshrl.u32 %v865_v5, 5 }
 0x397   : > { %v868_v10 = vsub.s32 32, %v867_v6  ;;  %v870_v12 = vshll.u32 %v2330_v35, %v867_v6  ;;  %v873_v13 = vshll.u32 %v2331_v37, %v867_v6  ;;  %v876_v16 = vshll.u32 %v2332_v40, %v867_v6 }
 0x398   : > { %v879_v19 = vshll.u32 %v2333_v43, %v867_v6  ;;  %v882_v22 = vshll.u32 %v2334_v46, %v867_v6  ;;  %vm885_vm13 = vcmp.lt.s32.totalorder %v866_v11, 1  ;;  %vm888_vm14 = vcmp.lt.s32.totalorder %v866_v11, 4 }
 0x399   : > { %v871_v14 = vshrl.u32 %v2331_v37, %v868_v10  ;;  %v874_v15 = vshrl.u32 %v2332_v40, %v868_v10  ;;  %v877_v18 = vshrl.u32 %v2333_v43, %v868_v10  ;;  %v880_v20 = vshrl.u32 %v2334_v46, %v868_v10 }
 0x39a   : > { %v883_v23 = vshrl.u32 %v2335_v49, %v868_v10  ;;  %v869_v34 = vshrl.u32 %v2330_v35, %v868_v10  ;;  %vm887_vm15 = vcmp.lt.s32.totalorder %v866_v11, 3  ;;  %vm886_vm1 = vcmp.lt.s32.totalorder %v866_v11, 2 }
 0x39b   : > { %v872_v25 = vor.u32 %v871_v14, %v870_v12  ;;  %v875_v26 = vor.u32 %v874_v15, %v873_v13  ;;  %v878_v27 = vor.u32 %v877_v18, %v876_v16  ;;  %v881_v28 = vor.u32 %v880_v20, %v879_v19 }
 0x39c   : > { %v884_v30 = vor.u32 %v883_v23, %v882_v22 }
 0x39d   : > { %v890_v31 = vsel %vm888_vm14, %v878_v27, 2102212464  ;;  %v893_v32 = vsel %vm885_vm13, %v872_v25, %v875_v26  ;;  %v897_v33 = vsel %vm885_vm13, %v875_v26, %v878_v27  ;;  %v894_v36 = vsel %vm888_vm14, %v881_v28, 920167782 }
 0x39e   : > { %v898_v38 = vsel %vm888_vm14, %v884_v30, 1326507024  ;;  %v895_v39 = vsel %vm887_vm15, %v878_v27, %v894_v36  ;;  %v889_v44 = vsel %vm885_vm13, %v869_v34, %v872_v25  ;;  %v891_v45 = vsel %vm887_vm15, %v875_v26, %v890_v31 }
 0x39f   : > { %v899_v41 = vsel %vm887_vm15, %v881_v28, %v898_v38  ;;  %v896_v47 = vsel %vm886_vm1, %v893_v32, %v895_v39  ;;  %v892_v54 = vsel %vm886_vm1, %v889_v44, %v891_v45  ;;  %v2204_v38 = vld [vmem:[#allocation2 + $0x80] sm:$0xff]   ;;  %v2205_v39 = vld [vmem:[#allocation2 + $0x88] sm:$0xff]   ;;  %v2210_v45 = vld [vmem:[#allocation2 + $0xb0] sm:$0xff]  }
 0x3a0   : > { %v900_v48 = vsel %vm886_vm1, %v897_v33, %v899_v41  ;;  %v2614_v52 = vmul.u32.u64.low %v901_v42, %v896_v47  ;;  %v2615_v53 = vmul.u32.u64.high %v901_v42, %v896_v47, %v2614_v52  ;;  %v908_v9 = vmul.u32 %v901_v42, %v892_v54  ;;  %2050 = vmatpush3.bf16.msra.mxu0 %v2204_v38  ;;  %v2206_v41 = vld [vmem:[#allocation2 + $0x90] sm:$0xff]   ;;  %v2209_v44 = vld [vmem:[#allocation2 + $0xa8] sm:$0xff]   ;;  %v2211_v47 = vld [vmem:[#allocation2 + $0xb8] sm:$0xff]  }
 0x3a1   : > { %v2611_v17 = vmul.u32.u64.low %v901_v42, %v900_v48  ;;  %v2612_v50 = vmul.u32.u64.high %v901_v42, %v900_v48, %v2611_v17  ;;  %2051 = vmatprep.subr.bf16.mxu0 %v2328_v0  ;;  %v2208_v42 = vld [vmem:[#allocation2 + $0xa0] sm:$0xff]  }
 0x3a2   : > { %v911_v8 = vadd.s32 1, %v2615_v53  ;;  %v1854_v48 = vld [vmem:[%s2801_s3 + $0x1] ss:$0 sm:$0xff] }
 0x3a3   : > { %vm910_vm2 = vc.u32 %v2612_v50, %v2614_v52  ;;  %v909_v2 = vadd.s32 %v2614_v52, %v2612_v50 }
 0x3a4   : > { %v912_v55 = vsel %vm910_vm2, %v911_v8, %v2615_v53  ;;  %2052 = vmatpush3.bf16.msra.mxu0 %v2205_v39 }
 0x3a5   : > { %v913_v56 = vadd.s32 %v912_v55, %v908_v9  ;;  %2053 = vmatprep.subr.bf16.mxu0 %v2328_v0 }
 0x3a7   : > { %v914_v57 = vadd.s32 536870912, %v913_v56 }
 0x3a8   : > { %2054 = vmatpush3.bf16.msra.mxu0 %v2206_v41 }
 0x3a9   : > { %v915_v58 = vshrl.u32 %v914_v57, 30  ;;  %2055 = vmatprep.subr.bf16.mxu0 %v2328_v0 }
 0x3ab   : > { %v916_v59 = vshll.u32 %v915_v58, 30  ;;  %v939_v18 = vsub.s32 4, %v915_v58 }
 0x3ad   : > { %v917_v29 = vsub.s32 %v913_v56, %v916_v59  ;;  %v940_v22 = vsel %vm855_vm4, %v939_v18, %v915_v58 }
 0x3ae   : > { %v942_v24 = vsel %vm854_vm5, 0, %v940_v22 }
 0x3af   : > { %v919_v61 = vsub.s32 0, %v917_v29  ;;  %v946_v25 = vadd.s32 3, %v942_v24 }
 0x3b1   : > { %v1850_v62 = vmin.u32 %v919_v61, %v917_v29  ;;  %v947_v26 = vand.u32 3, %v946_v25 }
 0x3b3   : > { %v921_v63 = vclz %v1850_v62  ;;  %vm952_vm6 = vcmp.eq.s32.totalorder %v947_v26, 2  ;;  %vm949_vm7 = vcmp.eq.s32.totalorder %v947_v26, 0  ;;  %vm948_vm8 = vcmp.lt.s32.totalorder %v947_v26, 2 }
 0x3b5   : > { %v1851_v1 = vadd.s32 4294967294, %v921_v63 }
 0x3b7   : > { %vm1852_vm3 = vcmp.lt.s32.totalorder %v1851_v1, 0 }
 0x3b8   : > { %v924_v21 = vsel %vm1852_vm3, 0, %v1851_v1 }
 0x3b9   : > { %v925_v3 = vsub.s32 32, %v924_v21  ;;  %v929_v5 = vsub.s32 4294967266, %v924_v21  ;;  %v926_v6 = vshll.u32 %v917_v29, %v924_v21 }
 0x3bb   : > { %v927_v7 = vshrl.u32 %v909_v2, %v925_v3  ;;  %v930_v10 = vadd.s32 127, %v929_v5 }
 0x3bd   : > { %v928_v11 = vor.u32 %v927_v7, %v926_v6  ;;  %v931_v12 = vshll.u32 %v930_v10, 23 }
 0x3bf   : > { %v932_v13 = vor.u32 4788187, %v931_v12  ;;  %v935_v15 = vcvt.s32.f32 %v928_v11 }
 0x3c1   : > { %v933_v14 = vand.u32 2147483647, %v932_v13 }
 0x3c3   : > { %v936_v16 = vmul.f32 %v935_v15, %v933_v14 }
 0x3c5   : > { %v937_v19 = vxor.u32 2147483648, %v936_v16 }
 0x3c7   : > { %v938_v20 = vsel %vm855_vm4, %v937_v19, %v936_v16 }
 0x3c8   : > { %v941_v23 = vsel %vm854_vm5, %v2594_v60, %v938_v20  ;;  %v2207_v60 = vld [vmem:[#allocation2 + $0x98] sm:$0xff]  }
 0x3c9   : > { %2236 = vcosq.f32 %v941_v23  ;;  %2056 = vmatpush3.bf16.msra.mxu0 %v2207_v60 }
 0x3ca   : > { %2238 = vsinq.f32 %v941_v23  ;;  %2057 = vmatprep.subr.bf16.mxu0 %v2328_v0 }
 0x3cd   : > { %2058 = vmatpush3.bf16.msra.mxu0 %v2208_v42 }
 0x3ce   : > { %2059 = vmatprep.subr.bf16.mxu0 %v2328_v0 }
 0x3d1   : > { %2060 = vmatpush3.bf16.msra.mxu0 %v2209_v44 }
 0x3d2   : > { %2061 = vmatprep.subr.bf16.mxu0 %v2328_v0 }
 0x3d3   : > { %v2237_v27 = vpop.eup %2236 }
 0x3d4   : > { %v2239_v28 = vpop.eup %2238  ;;  %v953_v30 = vxor.u32 2147483648, %v2237_v27 }
 0x3d5   : > { %v950_v31 = vxor.u32 2147483648, %v2239_v28  ;;  %2062 = vmatpush3.bf16.msra.mxu0 %v2210_v45 }
 0x3d6   : > { %v954_v32 = vsel %vm952_vm6, %v953_v30, %v2239_v28  ;;  %2063 = vmatprep.subr.bf16.mxu0 %v2328_v0 }
 0x3d7   : > { %v951_v33 = vsel %vm949_vm7, %v2237_v27, %v950_v31 }
 0x3d8   : > { %v955_v4 = vsel %vm948_vm8, %v951_v33, %v954_v32 }
 0x3d9   : > { %v956_v34 = vsel %vm945_vm9, nan, %v955_v4  ;;  %2064 = vmatpush3.bf16.msra.mxu0 %v2211_v47 }
 0x3da   : > { %v957_v36 = vpack.c.bf16 %v956_v34, %v956_v34  ;;  %2089 = vmatprep.subr.bf16.mxu0 %v2328_v0 }
 0x3dc   : > { %2046 = vmatmul.mubr.bf16.vlgmr.msra.gmra.mrb[4].mxu1 %v957_v36 }
 0x3dd   : > { %2085 = vmatprep.mubr.msk.bf16.mxu1 %vm2329_vm0, %v2328_v0 }
 0x4af   : > { %v1065_v17 = vpop.f32.mrb[4].mxu1 }
 0x4b0   : > { %v2639_v50 = vadd.f32 %v1854_v48, %v1065_v17  ;;  %v2047_v52 = vpop.f32.mrb[5].mxu1 }
 0x4b1   : > { %v1068_v53 = vpop.f32.mrb[6].mxu1 }
 0x4b2   : > { %v1074_v54 = vand.u32 2139095040, %v2639_v50  ;;  %v2048_v8 = vpop.f32.mrb[7].mxu1  ;;  %v1071_v57 = vand.u32 2147483647, %v2639_v50  ;;  %vm1073_vm2 = vcmp.lt.s32.totalorder %v2639_v50, 0  ;;  %vm1163_vm7 = vweird.f32 %v2639_v50 }
 0x4b4   : > { %v1075_v9 = vshrl.u32 %v1074_v54, 23  ;;  %v1078_v29 = vand.u32 8388607, %v1071_v57  ;;  %vm1072_vm3 = vcmp.le.f32.partialorder %v1071_v57, 0.7853982 }
 0x4b6   : > { %v1863_v55 = vadd.s32 4294967169, %v1075_v9  ;;  %v1079_v12 = vor.u32 8388608, %v1078_v29 }
 0x4b8   : > { %v1081_v56 = vadd.s32 1, %v1863_v55  ;;  %v1119_v28 = vshll.u32 %v1079_v12, 8 }
 0x4ba   : > { %vm1082_vm10 = vcmp.gt.s32.totalorder %v1081_v56, 0 }
 0x4bb   : > { %v1083_v58 = vsel %vm1082_vm10, %v1081_v56, 0 }
 0x4bc   : > { %v1085_v59 = vand.u32 31, %v1083_v58  ;;  %v1084_v62 = vshrl.u32 %v1083_v58, 5 }
 0x4be   : > { %v1086_v61 = vsub.s32 32, %v1085_v59  ;;  %v1088_v63 = vshll.u32 %v2330_v35, %v1085_v59  ;;  %v1091_v1 = vshll.u32 %v2331_v37, %v1085_v59  ;;  %v1094_v3 = vshll.u32 %v2332_v40, %v1085_v59 }
 0x4bf   : > { %v1097_v6 = vshll.u32 %v2333_v43, %v1085_v59  ;;  %v1100_v10 = vshll.u32 %v2334_v46, %v1085_v59  ;;  %vm1103_vm11 = vcmp.lt.s32.totalorder %v1084_v62, 1  ;;  %vm1106_vm12 = vcmp.lt.s32.totalorder %v1084_v62, 4 }
 0x4c0   : > { %v1089_v21 = vshrl.u32 %v2331_v37, %v1086_v61  ;;  %v1092_v2 = vshrl.u32 %v2332_v40, %v1086_v61  ;;  %v1095_v5 = vshrl.u32 %v2333_v43, %v1086_v61  ;;  %v1098_v7 = vshrl.u32 %v2334_v46, %v1086_v61 }
 0x4c1   : > { %v1101_v11 = vshrl.u32 %v2335_v49, %v1086_v61  ;;  %v1087_v23 = vshrl.u32 %v2330_v35, %v1086_v61  ;;  %vm1105_vm13 = vcmp.lt.s32.totalorder %v1084_v62, 3  ;;  %vm1104_vm14 = vcmp.lt.s32.totalorder %v1084_v62, 2 }
 0x4c2   : > { %v1090_v13 = vor.u32 %v1089_v21, %v1088_v63  ;;  %v1093_v14 = vor.u32 %v1092_v2, %v1091_v1  ;;  %v1096_v15 = vor.u32 %v1095_v5, %v1094_v3  ;;  %v1099_v16 = vor.u32 %v1098_v7, %v1097_v6 }
 0x4c3   : > { %v1102_v18 = vor.u32 %v1101_v11, %v1100_v10 }
 0x4c4   : > { %v1108_v19 = vsel %vm1106_vm12, %v1096_v15, 2102212464  ;;  %v1111_v20 = vsel %vm1103_vm11, %v1090_v13, %v1093_v14  ;;  %v1115_v22 = vsel %vm1103_vm11, %v1093_v14, %v1096_v15  ;;  %v1112_v24 = vsel %vm1106_vm12, %v1099_v16, 920167782 }
 0x4c5   : > { %v1116_v25 = vsel %vm1106_vm12, %v1102_v18, 1326507024  ;;  %v1113_v26 = vsel %vm1105_vm13, %v1096_v15, %v1112_v24  ;;  %v1107_v30 = vsel %vm1103_vm11, %v1087_v23, %v1090_v13  ;;  %v1109_v31 = vsel %vm1105_vm13, %v1093_v14, %v1108_v19 }
 0x4c6   : > { %v1117_v27 = vsel %vm1105_vm13, %v1099_v16, %v1116_v25  ;;  %v1114_v32 = vsel %vm1104_vm14, %v1111_v20, %v1113_v26  ;;  %v1110_v39 = vsel %vm1104_vm14, %v1107_v30, %v1109_v31  ;;  %v2212_v26 = vld [vmem:[#allocation4 + $0x80] sm:$0xff]   ;;  %v2217_v30 = vld [vmem:[#allocation4 + $0xa8] sm:$0xff]   ;;  %v2218_v31 = vld [vmem:[#allocation4 + $0xb0] sm:$0xff]  }
 0x4c7   : > { %v1118_v33 = vsel %vm1104_vm14, %v1115_v22, %v1117_v27  ;;  %v2659_v36 = vmul.u32.u64.low %v1119_v28, %v1114_v32  ;;  %v2660_v38 = vmul.u32.u64.high %v1119_v28, %v1114_v32, %v2659_v36  ;;  %v1126_v60 = vmul.u32 %v1119_v28, %v1110_v39  ;;  %2070 = vmatpush3.bf16.msra.mxu1 %v2212_v26  ;;  %v2213_v27 = vld [vmem:[#allocation4 + $0x88] sm:$0xff]   ;;  %v2219_v32 = vld [vmem:[#allocation4 + $0xb8] sm:$0xff]  }
 0x4c8   : > { %v2656_v4 = vmul.u32.u64.low %v1119_v28, %v1118_v33  ;;  %v2657_v34 = vmul.u32.u64.high %v1119_v28, %v1118_v33, %v2656_v4  ;;  %2071 = vmatprep.subr.bf16.mxu1 %v2328_v0  ;;  %v2216_v28 = vld [vmem:[#allocation4 + $0xa0] sm:$0xff]  }
 0x4c9   : > { %v1129_v41 = vadd.s32 1, %v2660_v38  ;;  %v1868_v33 = vld [vmem:[%s2799_s1 + $0x2] ss:$0 sm:$0xff] }
 0x4ca   : > { %vm1128_vm15 = vc.u32 %v2657_v34, %v2659_v36  ;;  %v1127_v55 = vadd.s32 %v2659_v36, %v2657_v34 }
 0x4cb   : > { %v1130_v42 = vsel %vm1128_vm15, %v1129_v41, %v2660_v38  ;;  %2072 = vmatpush3.bf16.msra.mxu1 %v2213_v27 }
 0x4cc   : > { %v1131_v44 = vadd.s32 %v1130_v42, %v1126_v60  ;;  %2073 = vmatprep.subr.bf16.mxu1 %v2328_v0 }
 0x4ce   : > { %v1132_v45 = vadd.s32 536870912, %v1131_v44 }
 0x4d0   : > { %v1133_v47 = vshrl.u32 %v1132_v45, 30 }
 0x4d2   : > { %v1134_v48 = vshll.u32 %v1133_v47, 30  ;;  %v1157_v5 = vsub.s32 4, %v1133_v47 }
 0x4d4   : > { %v1135_v17 = vsub.s32 %v1131_v44, %v1134_v48  ;;  %v1158_v10 = vsel %vm1073_vm2, %v1157_v5, %v1133_v47 }
 0x4d5   : > { %v1160_v12 = vsel %vm1072_vm3, 0, %v1158_v10 }
 0x4d6   : > { %v1137_v52 = vsub.s32 0, %v1135_v17  ;;  %v1164_v13 = vadd.s32 3, %v1160_v12 }
 0x4d8   : > { %v1864_v53 = vmin.u32 %v1137_v52, %v1135_v17  ;;  %v1165_v14 = vand.u32 3, %v1164_v13 }
 0x4da   : > { %v1139_v54 = vclz %v1864_v53  ;;  %vm1170_vm4 = vcmp.eq.s32.totalorder %v1165_v14, 2  ;;  %vm1167_vm5 = vcmp.eq.s32.totalorder %v1165_v14, 0  ;;  %vm1166_vm6 = vcmp.lt.s32.totalorder %v1165_v14, 2 }
 0x4dc   : > { %v1865_v8 = vadd.s32 4294967294, %v1139_v54 }
 0x4de   : > { %vm1866_vm1 = vcmp.lt.s32.totalorder %v1865_v8, 0 }
 0x4df   : > { %v1142_v9 = vsel %vm1866_vm1, 0, %v1865_v8 }
 0x4e0   : > { %v1143_v56 = vsub.s32 32, %v1142_v9  ;;  %v1147_v58 = vsub.s32 4294967266, %v1142_v9  ;;  %v1144_v59 = vshll.u32 %v1135_v17, %v1142_v9 }
 0x4e2   : > { %v1145_v29 = vshrl.u32 %v1127_v55, %v1143_v56  ;;  %v1148_v61 = vadd.s32 127, %v1147_v58 }
 0x4e4   : > { %v1146_v62 = vor.u32 %v1145_v29, %v1144_v59  ;;  %v1149_v63 = vshll.u32 %v1148_v61, 23 }
 0x4e6   : > { %v1150_v1 = vor.u32 4788187, %v1149_v63  ;;  %v1153_v2 = vcvt.s32.f32 %v1146_v62 }
 0x4e8   : > { %v1151_v21 = vand.u32 2147483647, %v1150_v1 }
 0x4ea   : > { %v1154_v3 = vmul.f32 %v1153_v2, %v1151_v21 }
 0x4ec   : > { %v1155_v6 = vxor.u32 2147483648, %v1154_v3 }
 0x4ee   : > { %v1156_v7 = vsel %vm1073_vm2, %v1155_v6, %v1154_v3 }
 0x4ef   : > { %v1159_v11 = vsel %vm1072_vm3, %v2639_v50, %v1156_v7  ;;  %v2214_v50 = vld [vmem:[#allocation4 + $0x90] sm:$0xff]  }
 0x4f0   : > { %2240 = vcosq.f32 %v1159_v11  ;;  %2074 = vmatpush3.bf16.msra.mxu1 %v2214_v50 }
 0x4f1   : > { %2242 = vsinq.f32 %v1159_v11  ;;  %2075 = vmatprep.subr.bf16.mxu1 %v2328_v0 }
 0x4fa   : > { %v2241_v15 = vpop.eup %2240 }
 0x4fb   : > { %v2243_v16 = vpop.eup %2242  ;;  %v1171_v18 = vxor.u32 2147483648, %v2241_v15 }
 0x4fc   : > { %v1168_v19 = vxor.u32 2147483648, %v2243_v16 }
 0x4fd   : > { %v1172_v20 = vsel %vm1170_vm4, %v1171_v18, %v2243_v16 }
 0x4fe   : > { %v1169_v22 = vsel %vm1167_vm5, %v2241_v15, %v1168_v19 }
 0x4ff   : > { %v1173_v57 = vsel %vm1166_vm6, %v1169_v22, %v1172_v20 }
 0x500   : > { %v1174_v23 = vsel %vm1163_vm7, nan, %v1173_v57 }
 0x501   : > { %v2672_v24 = vadd.f32 %v1174_v23, %v2577_v51  ;;  %v2215_v51 = vld [vmem:[#allocation4 + $0x98] sm:$0xff]  }
 0x502   : > { %2076 = vmatpush3.bf16.msra.mxu1 %v2215_v51 }
 0x503   : > { %v1176_v25 = vpack.c.bf16 %v2672_v24, %v2672_v24  ;;  %2077 = vmatprep.subr.bf16.mxu1 %v2328_v0 }
 0x505   : > { %2066 = vmatmul.mubr.bf16.vlgmr.msra.gmra.mrb[8].mxu0 %v1176_v25 }
 0x506   : > { %2105 = vmatprep.mubr.msk.bf16.mxu0 %vm2329_vm0, %v2328_v0  ;;  %2078 = vmatpush3.bf16.msra.mxu1 %v2216_v28 }
 0x507   : > { %2079 = vmatprep.subr.bf16.mxu1 %v2328_v0 }
 0x50a   : > { %2080 = vmatpush3.bf16.msra.mxu1 %v2217_v30 }
 0x50b   : > { %2081 = vmatprep.subr.bf16.mxu1 %v2328_v0 }
 0x50e   : > { %2082 = vmatpush3.bf16.msra.mxu1 %v2218_v31 }
 0x50f   : > { %2083 = vmatprep.subr.bf16.mxu1 %v2328_v0 }
 0x512   : > { %2084 = vmatpush3.bf16.msra.mxu1 %v2219_v32 }
 0x5d8   : > { %v1284_v4 = vpop.f32.mrb[8].mxu0 }
 0x5d9   : > { %v2688_v34 = vadd.f32 %v1868_v33, %v1284_v4  ;;  %v2067_v36 = vpop.f32.mrb[9].mxu0 }
 0x5da   : > { %v1287_v38 = vpop.f32.mrb[10].mxu0 }
 0x5db   : > { %v1293_v39 = vand.u32 2139095040, %v2688_v34  ;;  %v2068_v41 = vpop.f32.mrb[11].mxu0  ;;  %v1290_v45 = vand.u32 2147483647, %v2688_v34  ;;  %vm1292_vm14 = vcmp.lt.s32.totalorder %v2688_v34, 0  ;;  %vm1382_vm4 = vweird.f32 %v2688_v34 }
 0x5dd   : > { %v1294_v60 = vshrl.u32 %v1293_v39, 23  ;;  %v1297_v17 = vand.u32 8388607, %v1290_v45  ;;  %vm1291_vm15 = vcmp.le.f32.partialorder %v1290_v45, 0.7853982 }
 0x5df   : > { %v1877_v42 = vadd.s32 4294967169, %v1294_v60  ;;  %v1298_v63 = vor.u32 8388608, %v1297_v17 }
 0x5e1   : > { %v1300_v44 = vadd.s32 1, %v1877_v42  ;;  %v1338_v16 = vshll.u32 %v1298_v63, 8 }
 0x5e3   : > { %vm1301_vm0 = vcmp.gt.s32.totalorder %v1300_v44, 0 }
 0x5e4   : > { %v1302_v47 = vsel %vm1301_vm0, %v1300_v44, 0 }
 0x5e5   : > { %v1304_v48 = vand.u32 31, %v1302_v47  ;;  %v1303_v53 = vshrl.u32 %v1302_v47, 5 }
 0x5e7   : > { %v1305_v52 = vsub.s32 32, %v1304_v48  ;;  %v1307_v54 = vshll.u32 %v2330_v35, %v1304_v48  ;;  %v1310_v8 = vshll.u32 %v2331_v37, %v1304_v48  ;;  %v1313_v56 = vshll.u32 %v2332_v40, %v1304_v48 }
 0x5e8   : > { %v1316_v59 = vshll.u32 %v2333_v43, %v1304_v48  ;;  %v1319_v61 = vshll.u32 %v2334_v46, %v1304_v48  ;;  %vm1322_vm8 = vcmp.lt.s32.totalorder %v1303_v53, 1  ;;  %vm1325_vm9 = vcmp.lt.s32.totalorder %v1303_v53, 4 }
 0x5e9   : > { %v1308_v9 = vshrl.u32 %v2331_v37, %v1305_v52  ;;  %v1311_v55 = vshrl.u32 %v2332_v40, %v1305_v52  ;;  %v1314_v58 = vshrl.u32 %v2333_v43, %v1305_v52  ;;  %v1317_v29 = vshrl.u32 %v2334_v46, %v1305_v52 }
 0x5ea   : > { %v1320_v62 = vshrl.u32 %v2335_v49, %v1305_v52  ;;  %v1306_v11 = vshrl.u32 %v2330_v35, %v1305_v52  ;;  %vm1324_vm10 = vcmp.lt.s32.totalorder %v1303_v53, 3  ;;  %vm1323_vm11 = vcmp.lt.s32.totalorder %v1303_v53, 2 }
 0x5eb   : > { %v1309_v1 = vor.u32 %v1308_v9, %v1307_v54  ;;  %v1312_v21 = vor.u32 %v1311_v55, %v1310_v8  ;;  %v1315_v2 = vor.u32 %v1314_v58, %v1313_v56  ;;  %v1318_v3 = vor.u32 %v1317_v29, %v1316_v59 }
 0x5ec   : > { %v1321_v5 = vor.u32 %v1320_v62, %v1319_v61 }
 0x5ed   : > { %v1327_v6 = vsel %vm1325_vm9, %v1315_v2, 2102212464  ;;  %v1330_v7 = vsel %vm1322_vm8, %v1309_v1, %v1312_v21  ;;  %v1334_v10 = vsel %vm1322_vm8, %v1312_v21, %v1315_v2  ;;  %v1331_v12 = vsel %vm1325_vm9, %v1318_v3, 920167782 }
 0x5ee   : > { %v1335_v13 = vsel %vm1325_vm9, %v1321_v5, 1326507024  ;;  %v1332_v14 = vsel %vm1324_vm10, %v1315_v2, %v1331_v12  ;;  %v1326_v18 = vsel %vm1322_vm8, %v1306_v11, %v1309_v1  ;;  %v1328_v19 = vsel %vm1324_vm10, %v1312_v21, %v1327_v6 }
 0x5ef   : > { %v1336_v15 = vsel %vm1324_vm10, %v1318_v3, %v1335_v13  ;;  %v1333_v20 = vsel %vm1323_vm11, %v1330_v7, %v1332_v14  ;;  %v1329_v27 = vsel %vm1323_vm11, %v1326_v18, %v1328_v19  ;;  %v2220_v13 = vld [vmem:[%s2802_s4] sm:$0xff]   ;;  %v2221_v14 = vld [vmem:[%s2802_s4 + $0x8] sm:$0xff]   ;;  %v2226_v19 = vld [vmem:[%s2802_s4 + $0x30] sm:$0xff]  }
 0x5f0   : > { %v1337_v22 = vsel %vm1323_vm11, %v1334_v10, %v1336_v15  ;;  %v2708_v25 = vmul.u32.u64.low %v1338_v16, %v1333_v20  ;;  %v2709_v26 = vmul.u32.u64.high %v1338_v16, %v1333_v20, %v2708_v25  ;;  %v1345_v51 = vmul.u32 %v1338_v16, %v1329_v27  ;;  %2090 = vmatpush3.bf16.msra.mxu0 %v2220_v13  ;;  %v2223_v15 = vld [vmem:[%s2802_s4 + $0x18] sm:$0xff]   ;;  %v2225_v18 = vld [vmem:[%s2802_s4 + $0x28] sm:$0xff]  }
 0x5f1   : > { %v2705_v57 = vmul.u32.u64.low %v1338_v16, %v1337_v22  ;;  %v2706_v23 = vmul.u32.u64.high %v1338_v16, %v1337_v22, %v2705_v57  ;;  %2091 = vmatprep.subr.bf16.mxu0 %v2328_v0  ;;  %v2224_v16 = vld [vmem:[%s2802_s4 + $0x20] sm:$0xff]   ;;  %v2227_v20 = vld [vmem:[%s2802_s4 + $0x38] sm:$0xff]  }
 0x5f2   : > { %v1348_v50 = vadd.s32 1, %v2709_v26  ;;  %v1882_v22 = vld [vmem:[%s2801_s3 + $0x2] ss:$0 sm:$0xff] }
 0x5f3   : > { %vm1347_vm12 = vc.u32 %v2706_v23, %v2708_v25  ;;  %v1346_v42 = vadd.s32 %v2708_v25, %v2706_v23 }
 0x5f4   : > { %v1349_v28 = vsel %vm1347_vm12, %v1348_v50, %v2709_v26  ;;  %2092 = vmatpush3.bf16.msra.mxu0 %v2221_v14 }
 0x5f5   : > { %v1350_v30 = vadd.s32 %v1349_v28, %v1345_v51  ;;  %2093 = vmatprep.subr.bf16.mxu0 %v2328_v0 }
 0x5f7   : > { %v1351_v31 = vadd.s32 536870912, %v1350_v30 }
 0x5f9   : > { %v1352_v32 = vshrl.u32 %v1351_v31, 30 }
 0x5fb   : > { %v1353_v33 = vshll.u32 %v1352_v32, 30  ;;  %v1376_v58 = vsub.s32 4, %v1352_v32 }
 0x5fd   : > { %v1354_v4 = vsub.s32 %v1350_v30, %v1353_v33  ;;  %v1377_v61 = vsel %vm1292_vm14, %v1376_v58, %v1352_v32 }
 0x5fe   : > { %v1379_v63 = vsel %vm1291_vm15, 0, %v1377_v61 }
 0x5ff   : > { %v1356_v36 = vsub.s32 0, %v1354_v4  ;;  %v1383_v1 = vadd.s32 3, %v1379_v63 }
 0x601   : > { %v1878_v38 = vmin.u32 %v1356_v36, %v1354_v4  ;;  %v1384_v21 = vand.u32 3, %v1383_v1 }
 0x603   : > { %v1358_v39 = vclz %v1878_v38  ;;  %vm1389_vm1 = vcmp.eq.s32.totalorder %v1384_v21, 2  ;;  %vm1386_vm2 = vcmp.eq.s32.totalorder %v1384_v21, 0  ;;  %vm1385_vm3 = vcmp.lt.s32.totalorder %v1384_v21, 2 }
 0x605   : > { %v1879_v41 = vadd.s32 4294967294, %v1358_v39 }
 0x607   : > { %vm1880_vm13 = vcmp.lt.s32.totalorder %v1879_v41, 0 }
 0x608   : > { %v1361_v60 = vsel %vm1880_vm13, 0, %v1879_v41 }
 0x609   : > { %v1362_v44 = vsub.s32 32, %v1361_v60  ;;  %v1366_v47 = vsub.s32 4294967266, %v1361_v60  ;;  %v1363_v48 = vshll.u32 %v1354_v4, %v1361_v60 }
 0x60b   : > { %v1364_v17 = vshrl.u32 %v1346_v42, %v1362_v44  ;;  %v1367_v52 = vadd.s32 127, %v1366_v47 }
 0x60d   : > { %v1365_v53 = vor.u32 %v1364_v17, %v1363_v48  ;;  %v1368_v54 = vshll.u32 %v1367_v52, 23 }
 0x60f   : > { %v1369_v8 = vor.u32 4788187, %v1368_v54  ;;  %v1372_v55 = vcvt.s32.f32 %v1365_v53 }
 0x611   : > { %v1370_v9 = vand.u32 2147483647, %v1369_v8 }
 0x613   : > { %v1373_v56 = vmul.f32 %v1372_v55, %v1370_v9 }
 0x615   : > { %v1374_v59 = vxor.u32 2147483648, %v1373_v56 }
 0x617   : > { %v1375_v29 = vsel %vm1292_vm14, %v1374_v59, %v1373_v56 }
 0x618   : > { %v1378_v62 = vsel %vm1291_vm15, %v2688_v34, %v1375_v29  ;;  %v2222_v34 = vld [vmem:[%s2802_s4 + $0x10] sm:$0xff]  }
 0x619   : > { %2244 = vcosq.f32 %v1378_v62  ;;  %2094 = vmatpush3.bf16.msra.mxu0 %v2222_v34 }
 0x61a   : > { %2246 = vsinq.f32 %v1378_v62  ;;  %2095 = vmatprep.subr.bf16.mxu0 %v2328_v0 }
 0x61d   : > { %2096 = vmatpush3.bf16.msra.mxu0 %v2223_v15 }
 0x61e   : > { %2097 = vmatprep.subr.bf16.mxu0 %v2328_v0 }
 0x621   : > { %2098 = vmatpush3.bf16.msra.mxu0 %v2224_v16 }
 0x622   : > { %2099 = vmatprep.subr.bf16.mxu0 %v2328_v0 }
 0x623   : > { %v2245_v2 = vpop.eup %2244 }
 0x624   : > { %v2247_v3 = vpop.eup %2246  ;;  %v1390_v5 = vxor.u32 2147483648, %v2245_v2 }
 0x625   : > { %v1387_v6 = vxor.u32 2147483648, %v2247_v3  ;;  %2100 = vmatpush3.bf16.msra.mxu0 %v2225_v18 }
 0x626   : > { %v1391_v7 = vsel %vm1389_vm1, %v1390_v5, %v2247_v3  ;;  %2101 = vmatprep.subr.bf16.mxu0 %v2328_v0 }
 0x627   : > { %v1388_v10 = vsel %vm1386_vm2, %v2245_v2, %v1387_v6  ;;  %vm1725_vm2 = vcmask 31744  }
 0x628   : > { %v1392_v45 = vsel %vm1385_vm3, %v1388_v10, %v1391_v7 }
 0x629   : > { %v1393_v11 = vsel %vm1382_vm4, nan, %v1392_v45  ;;  %2102 = vmatpush3.bf16.msra.mxu0 %v2226_v19 }
 0x62a   : > { %v1394_v12 = vpack.c.bf16 %v1393_v11, %v1393_v11  ;;  %2103 = vmatprep.subr.bf16.mxu0 %v2328_v0 }
 0x62c   : > { %2086 = vmatmul.mubr.bf16.vlgmr.msra.gmra.mrb[8].mxu1 %v1394_v12 }
 0x62d   : > { %2104 = vmatpush3.bf16.msra.mxu0 %v2227_v20 }
 0x6ff   : > { %v1502_v57 = vpop.f32.mrb[8].mxu1 }
 0x700   : > { %v2754_v23 = vadd.f32 %v1882_v22, %v1502_v57  ;;  %v2087_v25 = vpop.f32.mrb[9].mxu1 }
 0x701   : > { %v1505_v26 = vpop.f32.mrb[10].mxu1 }
 0x702   : > { %v1511_v27 = vand.u32 2139095040, %v2754_v23  ;;  %v2088_v50 = vpop.f32.mrb[11].mxu1  ;;  %v1508_v31 = vand.u32 2147483647, %v2754_v23  ;;  %vm1510_vm11 = vcmp.lt.s32.totalorder %v2754_v23, 0  ;;  %vm1600_vm1 = vweird.f32 %v2754_v23 }
 0x704   : > { %v1512_v51 = vshrl.u32 %v1511_v27, 23  ;;  %v1515_v33 = vand.u32 8388607, %v1508_v31  ;;  %vm1509_vm12 = vcmp.le.f32.partialorder %v1508_v31, 0.7853982 }
 0x706   : > { %v1891_v28 = vadd.s32 4294967169, %v1512_v51  ;;  %v1516_v53 = vor.u32 8388608, %v1515_v33 }
 0x708   : > { %v1518_v30 = vadd.s32 1, %v1891_v28 }
 0x70a   : > { %vm1519_vm5 = vcmp.gt.s32.totalorder %v1518_v30, 0 }
 0x70b   : > { %v1520_v0 = vsel %vm1519_vm5, %v1518_v30, 0 }
 0x70c   : > { %v1522_v32 = vand.u32 31, %v1520_v0  ;;  %v1521_v36 = vshrl.u32 %v1520_v0, 5 }
 0x70e   : > { %v1523_v4 = vsub.s32 32, %v1522_v32  ;;  %v1525_v38 = vshll.u32 %v2330_v35, %v1522_v32  ;;  %v1528_v39 = vshll.u32 %v2331_v37, %v1522_v32  ;;  %v1531_v42 = vshll.u32 %v2332_v40, %v1522_v32 }
 0x70f   : > { %v1534_v47 = vshll.u32 %v2333_v43, %v1522_v32  ;;  %v1537_v17 = vshll.u32 %v2334_v46, %v1522_v32  ;;  %vm1540_vm6 = vcmp.lt.s32.totalorder %v1521_v36, 1  ;;  %vm1543_vm7 = vcmp.lt.s32.totalorder %v1521_v36, 4 }
 0x710   : > { %v1526_v41 = vshrl.u32 %v2331_v37, %v1523_v4  ;;  %v1529_v60 = vshrl.u32 %v2332_v40, %v1523_v4  ;;  %v1532_v44 = vshrl.u32 %v2333_v43, %v1523_v4  ;;  %v1535_v48 = vshrl.u32 %v2334_v46, %v1523_v4 }
 0x711   : > { %v1538_v52 = vshrl.u32 %v2335_v49, %v1523_v4  ;;  %v1524_v59 = vshrl.u32 %v2330_v35, %v1523_v4  ;;  %vm1542_vm0 = vcmp.lt.s32.totalorder %v1521_v36, 3  ;;  %vm1541_vm8 = vcmp.lt.s32.totalorder %v1521_v36, 2 }
 0x712   : > { %v1527_v54 = vor.u32 %v1526_v41, %v1525_v38  ;;  %v1530_v8 = vor.u32 %v1529_v60, %v1528_v39  ;;  %v1533_v9 = vor.u32 %v1532_v44, %v1531_v42  ;;  %v1536_v55 = vor.u32 %v1535_v48, %v1534_v47 }
 0x713   : > { %v1539_v37 = vor.u32 %v1538_v52, %v1537_v17  ;;  %v1556_v49 = vshll.u32 %v1516_v53, 8 }
 0x714   : > { %v1545_v56 = vsel %vm1543_vm7, %v1533_v9, 2102212464  ;;  %v1548_v40 = vsel %vm1540_vm6, %v1527_v54, %v1530_v8  ;;  %v1552_v58 = vsel %vm1540_vm6, %v1530_v8, %v1533_v9  ;;  %v1549_v43 = vsel %vm1543_vm7, %v1536_v55, 920167782 }
 0x715   : > { %v1553_v29 = vsel %vm1543_vm7, %v1539_v37, 1326507024  ;;  %v1550_v46 = vsel %vm1542_vm0, %v1533_v9, %v1549_v43  ;;  %v1544_v62 = vsel %vm1540_vm6, %v1524_v59, %v1527_v54  ;;  %v1546_v63 = vsel %vm1542_vm0, %v1530_v8, %v1545_v56  ;;  %v1895_v37 = vld [vmem:[%s2803_s5] ss:$0 sm:$0xff] }
 0x716   : > { %v1554_v61 = vsel %vm1542_vm0, %v1536_v55, %v1553_v29  ;;  %v1551_v1 = vsel %vm1541_vm8, %v1548_v40, %v1550_v46  ;;  %v1547_v7 = vsel %vm1541_vm8, %v1544_v62, %v1546_v63 }
 0x717   : > { %v1555_v21 = vsel %vm1541_vm8, %v1552_v58, %v1554_v61  ;;  %v2774_v5 = vmul.u32.u64.low %v1556_v49, %v1551_v1  ;;  %v2775_v6 = vmul.u32.u64.high %v1556_v49, %v1551_v1, %v2774_v5  ;;  %v1563_v10 = vmul.u32 %v1556_v49, %v1547_v7 }
 0x718   : > { %v2771_v2 = vmul.u32.u64.low %v1556_v49, %v1555_v21  ;;  %v2772_v3 = vmul.u32.u64.high %v1556_v49, %v1555_v21, %v2771_v2 }
 0x719   : > { %v1566_v35 = vadd.s32 1, %v2775_v6 }
 0x71a   : > { %vm1565_vm9 = vc.u32 %v2772_v3, %v2774_v5  ;;  %v1564_v22 = vadd.s32 %v2774_v5, %v2772_v3 }
 0x71b   : > { %v1567_v45 = vsel %vm1565_vm9, %v1566_v35, %v2775_v6 }
 0x71c   : > { %v1568_v11 = vadd.s32 %v1567_v45, %v1563_v10 }
 0x71e   : > { %v1569_v12 = vadd.s32 536870912, %v1568_v11 }
 0x720   : > { %v1570_v13 = vshrl.u32 %v1569_v12, 30 }
 0x722   : > { %v1571_v14 = vshll.u32 %v1570_v13, 30  ;;  %v1594_v4 = vsub.s32 4, %v1570_v13 }
 0x724   : > { %v1572_v34 = vsub.s32 %v1568_v11, %v1571_v14  ;;  %v1595_v39 = vsel %vm1510_vm11, %v1594_v4, %v1570_v13 }
 0x725   : > { %v1597_v60 = vsel %vm1509_vm12, 0, %v1595_v39 }
 0x726   : > { %v1574_v15 = vsub.s32 0, %v1572_v34  ;;  %v1601_v42 = vadd.s32 3, %v1597_v60 }
 0x728   : > { %v1892_v16 = vmin.u32 %v1574_v15, %v1572_v34  ;;  %v1602_v44 = vand.u32 3, %v1601_v42 }
 0x72a   : > { %v1576_v18 = vclz %v1892_v16  ;;  %vm1607_vm13 = vcmp.eq.s32.totalorder %v1602_v44, 2  ;;  %vm1604_vm14 = vcmp.eq.s32.totalorder %v1602_v44, 0  ;;  %vm1603_vm15 = vcmp.lt.s32.totalorder %v1602_v44, 2 }
 0x72c   : > { %v1893_v19 = vadd.s32 4294967294, %v1576_v18 }
 0x72e   : > { %vm1894_vm10 = vcmp.lt.s32.totalorder %v1893_v19, 0 }
 0x72f   : > { %v1579_v20 = vsel %vm1894_vm10, 0, %v1893_v19 }
 0x730   : > { %v1580_v57 = vsub.s32 32, %v1579_v20  ;;  %v1584_v25 = vsub.s32 4294967266, %v1579_v20  ;;  %v1581_v26 = vshll.u32 %v1572_v34, %v1579_v20 }
 0x732   : > { %v1582_v27 = vshrl.u32 %v1564_v22, %v1580_v57  ;;  %v1585_v50 = vadd.s32 127, %v1584_v25 }
 0x734   : > { %v1583_v51 = vor.u32 %v1582_v27, %v1581_v26  ;;  %v1586_v28 = vshll.u32 %v1585_v50, 23 }
 0x736   : > { %v1587_v30 = vor.u32 4788187, %v1586_v28  ;;  %v1590_v32 = vcvt.s32.f32 %v1583_v51 }
 0x738   : > { %v1588_v0 = vand.u32 2147483647, %v1587_v30 }
 0x73a   : > { %v1591_v33 = vmul.f32 %v1590_v32, %v1588_v0 }
 0x73c   : > { %v1592_v36 = vxor.u32 2147483648, %v1591_v33 }
 0x73e   : > { %v1593_v38 = vsel %vm1510_vm11, %v1592_v36, %v1591_v33 }
 0x73f   : > { %v1596_v41 = vsel %vm1509_vm12, %v2754_v23, %v1593_v38 }
 0x740   : > { %2248 = vcosq.f32 %v1596_v41 }
 0x741   : > { %2250 = vsinq.f32 %v1596_v41 }
 0x74a   : > { %v2249_v47 = vpop.eup %2248 }
 0x74b   : > { %v2251_v48 = vpop.eup %2250  ;;  %v1608_v17 = vxor.u32 2147483648, %v2249_v47 }
 0x74c   : > { %v1605_v52 = vxor.u32 2147483648, %v2251_v48 }
 0x74d   : > { %v1609_v53 = vsel %vm1607_vm13, %v1608_v17, %v2251_v48 }
 0x74e   : > { %v1606_v54 = vsel %vm1604_vm14, %v2249_v47, %v1605_v52 }
 0x74f   : > { %v1610_v31 = vsel %vm1603_vm15, %v1606_v54, %v1609_v53 }
 0x750   : > { %v1611_v8 = vsel %vm1600_vm1, nan, %v1610_v31 }
 0x751   : > { %v1612_v9 = vadd.f32 %v1611_v8, %v2672_v24 }
 0x753   : > { %v1613_v55 = vpack.c.bf16 %v1612_v9, %v1612_v9 }
 0x755   : > { %2106 = vmatmul.mubr.bf16.vlgmr.msra.gmra.mrb[12].mxu0 %v1613_v55 }
 0x828   : > { %v1719_v56 = vpop.f32.mrb[12].mxu0 }
 0x829   : > { %v1720_v40 = vadd.f32 %v1895_v37, %v1719_v56  ;;  %v2107_v58 = vpop.f32.mrb[13].mxu0 }
 0x82a   : > { %v1722_v23 = vpop.f32.mrb[14].mxu0 }
 0x82b   : > { %1726 = vst.msk [vmem:[%s303_s9] sm:$0xff] %vm1725_vm2, %v1720_v40  ;;  %v2108_v59 = vpop.f32.mrb[15].mxu0 }
 0x82c PF: > { %s19_s24 = sadd.s32 1, %s2322_s24  }
 0x82d   : > { %p16_p9 = scmp.ge.s32.totalorder %s19_s24, 4  }
 0x82f   :  { %18 = sbr.rel (!%p16_p9) target bundleno = 2 (0x2), region = 95 }
 0x836   :  { %1746 = vsyncpa [#allocation3], 1 }
 0x837   :  { %1748 = vsyncpa [#allocation3 + $0x1], 1 }
 0x838   :  { %1749 = vsyncpa [#allocation5], 1 }

</bundles_post_ra>
